<compile_context>
chip_gen: v7x
topology: tpu7x:2x2x1
jax: 0.10.0
libtpu: 0.0.40
codegen_flags: <defaults>
</compile_context>

<pallas_src>
import jax
import jax.numpy as jnp
from jax.experimental import pallas as pl
from jax.experimental.pallas import tpu as pltpu

LANE = 128  # TPU lane width; all feature dims padded to a multiple of this.


def _round_up(n, m):
    return ((n + m - 1) // m) * m


def qnet_kernel(x_ref, w0_ref, b0_ref, w1_ref, b1_ref, wo_ref, bo_ref, out_ref):
    """Skip-sum MLP forward for one batch tile; everything resident in VMEM."""
    x = x_ref[...]                              # (TB, S_pad) bf16 (pre-cast)

    b0 = b0_ref[...]                            # (1, H_pad) f32
    b1 = b1_ref[...]
    bo = bo_ref[...]

    # layer 0: y = relu(x @ W0 + b0)   (bf16 MXU, f32 accumulate)
    y = jnp.dot(x, w0_ref[...], preferred_element_type=jnp.float32) + b0
    y = jnp.maximum(y, 0.0)

    # layer 1: z = relu(y @ W1 + b1)
    z = jnp.dot(y.astype(jnp.bfloat16), w1_ref[...],
                preferred_element_type=jnp.float32) + b1
    z = jnp.maximum(z, 0.0)

    # output head on the skip-sum (y + z)
    s = (y + z).astype(jnp.bfloat16)
    o = jnp.dot(s, wo_ref[...], preferred_element_type=jnp.float32) + bo
    out_ref[...] = o.astype(out_ref.dtype)      # bf16 lane-dense writeback


def _num_tensorcores():
    """Best-effort TensorCores per JAX device: 2 on v7x, 1 on v5e/v6e."""
    try:
        kind = jax.devices()[0].device_kind.lower()
    except Exception:
        return 1
    return 2 if ("v7" in kind or "7x" in kind) else 1


def _choose_batch_tiling(batch, n_tc, max_tile=512):
    """Pick (tile_rows, n_tiles, padded_batch).

    One tile per TensorCore when the batch fits (single grid step on
    single-TC v5e/v6e; even 2-way split on v7x); otherwise >=256-row tiles
    with the tile count a multiple of n_tc. Rows rounded to 16 for bf16
    sublane packing.
    """
    b16 = _round_up(batch, 16)
    if b16 <= n_tc * max_tile:
        n_tiles = n_tc
        tb = _round_up(pl.cdiv(b16, n_tc), 16)
    else:
        tb = max_tile
        n_tiles = _round_up(pl.cdiv(b16, tb), n_tc)
    return tb, n_tiles, tb * n_tiles


def qnetwork_forward(x, params, action_size, *, max_batch_tile=512):
    """Run the padded QNetwork kernel and slice back to logical shapes.

    `params` are the padded tensors produced by `init_params`:
      w* : bf16, (in_pad, out_pad) ; b* : f32, (1, out_pad)
    `x` is the logical (batch, state_size) state batch (f32 or bf16).
    """
    w0, b0, w1, b1, wo, bo = params
    batch, state_size = x.shape
    s_pad, h_pad = w0.shape
    a_pad = wo.shape[1]

    n_tc = _num_tensorcores()
    tb, n_tiles, b_pad = _choose_batch_tiling(batch, n_tc, max_batch_tile)

    # Fused pad + bf16 cast (single cheap op; zero padding keeps logical
    # results unchanged). Ideally states live pre-padded bf16 in the buffer.
    x_p = jnp.pad(x.astype(jnp.bfloat16),
                  ((0, b_pad - batch), (0, s_pad - state_size)))

    flops = 2 * b_pad * (s_pad * h_pad + h_pad * h_pad + h_pad * a_pad)
    bytes_accessed = (
        x_p.size * 2                               # bf16 input
        + (w0.size + w1.size + wo.size) * 2        # bf16 weights
        + (b0.size + b1.size + bo.size) * 4        # f32 biases
        + b_pad * a_pad * 2                        # bf16 output
    )

    const = lambda i: (0, 0)  # weights/biases resident across batch tiles

    out_p = pl.pallas_call(
        qnet_kernel,
        out_shape=jax.ShapeDtypeStruct((b_pad, a_pad), jnp.bfloat16),
        grid=(n_tiles,),
        in_specs=[
            pl.BlockSpec((tb, s_pad), lambda i: (i, 0)),   # x tile
            pl.BlockSpec((s_pad, h_pad), const),           # W0
            pl.BlockSpec((1, h_pad), const),               # b0
            pl.BlockSpec((h_pad, h_pad), const),           # W1
            pl.BlockSpec((1, h_pad), const),               # b1
            pl.BlockSpec((h_pad, a_pad), const),           # Wo
            pl.BlockSpec((1, a_pad), const),               # bo
        ],
        out_specs=pl.BlockSpec((tb, a_pad), lambda i: (i, 0)),
        compiler_params=pltpu.CompilerParams(
            dimension_semantics=("parallel",)),
        cost_estimate=pl.CostEstimate(
            flops=flops, transcendentals=0, bytes_accessed=bytes_accessed),
    )(x_p, w0, b0, w1, b1, wo, bo)

    return out_p[:batch, :action_size]


def init_params(key, state_size, hidden_size, action_size, lane=LANE):
    """PyTorch-Linear-style init U(-1/sqrt(fan_in), 1/sqrt(fan_in)), stored
    pre-transposed as (in, out), zero-padded to lane multiples. Weights bf16,
    biases f32. Zero padding keeps the logical forward exactly unchanged."""
    s_pad = _round_up(state_size, lane)
    h_pad = _round_up(hidden_size, lane)
    a_pad = _round_up(action_size, lane)
    ks = jax.random.split(key, 6)

    def lin(kw, kb, fan_in, fan_out, in_pad, out_pad):
        bound = 1.0 / jnp.sqrt(jnp.float32(fan_in))
        w = jax.random.uniform(kw, (fan_in, fan_out), jnp.float32, -bound, bound)
        b = jax.random.uniform(kb, (1, fan_out), jnp.float32, -bound, bound)
        w_p = jnp.zeros((in_pad, out_pad), jnp.float32).at[:fan_in, :fan_out].set(w)
        b_p = jnp.zeros((1, out_pad), jnp.float32).at[:, :fan_out].set(b)
        return w_p.astype(jnp.bfloat16), b_p

    w0, b0 = lin(ks[0], ks[1], state_size, hidden_size, s_pad, h_pad)
    w1, b1 = lin(ks[2], ks[3], hidden_size, hidden_size, h_pad, h_pad)
    wo, bo = lin(ks[4], ks[5], hidden_size, action_size, h_pad, a_pad)
    return (w0, b0, w1, b1, wo, bo)


def qnetwork_reference(x, params, action_size):
    """Pure-JAX reference of _forward_skip_sum using the same bf16 inputs /
    weights and f32 accumulation, for tight numerical comparison."""
    w0, b0, w1, b1, wo, bo = params
    batch, state_size = x.shape
    s_pad = w0.shape[0]
    x_p = jnp.pad(x.astype(jnp.bfloat16), ((0, 0), (0, s_pad - state_size)))

    y = jnp.maximum(jnp.dot(x_p, w0, preferred_element_type=jnp.float32) + b0, 0.0)
    z = jnp.maximum(jnp.dot(y.astype(jnp.bfloat16), w1,
                            preferred_element_type=jnp.float32) + b1, 0.0)
    o = jnp.dot((y + z).astype(jnp.bfloat16), wo,
                preferred_element_type=jnp.float32) + bo
    return o[:, :action_size]


if __name__ == "__main__":
    # Shapes consistent with the module defaults (hidden_size=256), with a
    # realistic replay-batch so the kernel isn't pure launch overhead.
    batch = 256
    state_size = 64
    hidden_size = 256   # nn.Module default
    action_size = 26

    key = jax.random.PRNGKey(0)
    k_x, k_p = jax.random.split(key)
    x = jax.random.normal(k_x, (batch, state_size), jnp.float32)
    params = init_params(k_p, state_size, hidden_size, action_size)

    out = qnetwork_forward(x, params, action_size)
    out = jax.block_until_ready(out)

    ref = qnetwork_reference(x, params, action_size)
    assert out.shape == (batch, action_size)
    out_f32 = out.astype(jnp.float32)
    err = float(jnp.max(jnp.abs(out_f32 - ref)))
    assert jnp.allclose(out_f32, ref, atol=2e-2, rtol=2e-2), err

    print("KERNEL_OK")
</pallas_src>

<mosaic_0001>
module attributes {stable_mosaic.version = 11 : i64} {
  func.func @qnet_kernel(%arg0: i32, %arg1: memref<256x128xbf16, #tpu.memory_space<vmem>>, %arg2: memref<128x256xbf16, #tpu.memory_space<vmem>>, %arg3: memref<1x256xf32, #tpu.memory_space<vmem>>, %arg4: memref<256x256xbf16, #tpu.memory_space<vmem>>, %arg5: memref<1x256xf32, #tpu.memory_space<vmem>>, %arg6: memref<256x128xbf16, #tpu.memory_space<vmem>>, %arg7: memref<1x128xf32, #tpu.memory_space<vmem>>, %arg8: memref<256x128xbf16, #tpu.memory_space<vmem>>) attributes {dimension_semantics = [#tpu.dimension_semantics<parallel>], iteration_bounds = array<i64: 1>, scalar_prefetch = 0 : i64, scratch_operands = 0 : i64, tpu.core_type = #tpu.core_type<tc>, window_params = [{transform_indices = @transform_0, window_bounds = array<i64: 256, 128>}, {pipeline_mode = #tpu.pipeline_mode<synchronous>, transform_indices = @transform_1, window_bounds = array<i64: 128, 256>}, {pipeline_mode = #tpu.pipeline_mode<synchronous>, transform_indices = @transform_2, window_bounds = array<i64: 1, 256>}, {pipeline_mode = #tpu.pipeline_mode<synchronous>, transform_indices = @transform_3, window_bounds = array<i64: 256, 256>}, {pipeline_mode = #tpu.pipeline_mode<synchronous>, transform_indices = @transform_4, window_bounds = array<i64: 1, 256>}, {pipeline_mode = #tpu.pipeline_mode<synchronous>, transform_indices = @transform_5, window_bounds = array<i64: 256, 128>}, {pipeline_mode = #tpu.pipeline_mode<synchronous>, transform_indices = @transform_6, window_bounds = array<i64: 1, 128>}, {transform_indices = @transform_7, window_bounds = array<i64: 256, 128>}]} {
    %c0 = arith.constant 0 : index
    %c0_0 = arith.constant 0 : index
    %0 = vector.load %arg1[%c0, %c0_0] : memref<256x128xbf16, #tpu.memory_space<vmem>>, vector<256x128xbf16>
    %c0_1 = arith.constant 0 : index
    %c0_2 = arith.constant 0 : index
    %1 = vector.load %arg3[%c0_1, %c0_2] : memref<1x256xf32, #tpu.memory_space<vmem>>, vector<1x256xf32>
    %c0_3 = arith.constant 0 : index
    %c0_4 = arith.constant 0 : index
    %2 = vector.load %arg5[%c0_3, %c0_4] : memref<1x256xf32, #tpu.memory_space<vmem>>, vector<1x256xf32>
    %c0_5 = arith.constant 0 : index
    %c0_6 = arith.constant 0 : index
    %3 = vector.load %arg7[%c0_5, %c0_6] : memref<1x128xf32, #tpu.memory_space<vmem>>, vector<1x128xf32>
    %c0_7 = arith.constant 0 : index
    %c0_8 = arith.constant 0 : index
    %4 = vector.load %arg2[%c0_7, %c0_8] : memref<128x256xbf16, #tpu.memory_space<vmem>>, vector<128x256xbf16>
    %cst = arith.constant dense<0.000000e+00> : vector<256x256xf32>
    %5 = tpu.matmul %0, %4, %cst {dimension_numbers = #tpu.dot_dimension_numbers<[1], [0], [0], [1], [0, 0, 1, 1], [], []>} : vector<256x128xbf16>, vector<128x256xbf16>, vector<256x256xf32> -> vector<256x256xf32>
    %6 = vector.broadcast %1 : vector<1x256xf32> to vector<256x256xf32>
    %7 = arith.addf %5, %6 : vector<256x256xf32>
    %cst_9 = arith.constant 0.000000e+00 : f32
    %8 = vector.broadcast %cst_9 : f32 to vector<256x256xf32>
    %9 = arith.maximumf %7, %8 : vector<256x256xf32>
    %10 = arith.truncf %9 : vector<256x256xf32> to vector<256x256xbf16>
    %c0_10 = arith.constant 0 : index
    %c0_11 = arith.constant 0 : index
    %11 = vector.load %arg4[%c0_10, %c0_11] : memref<256x256xbf16, #tpu.memory_space<vmem>>, vector<256x256xbf16>
    %cst_12 = arith.constant dense<0.000000e+00> : vector<256x256xf32>
    %12 = tpu.matmul %10, %11, %cst_12 {dimension_numbers = #tpu.dot_dimension_numbers<[1], [0], [0], [1], [0, 0, 1, 1], [], []>} : vector<256x256xbf16>, vector<256x256xbf16>, vector<256x256xf32> -> vector<256x256xf32>
    %13 = vector.broadcast %2 : vector<1x256xf32> to vector<256x256xf32>
    %14 = arith.addf %12, %13 : vector<256x256xf32>
    %cst_13 = arith.constant 0.000000e+00 : f32
    %15 = vector.broadcast %cst_13 : f32 to vector<256x256xf32>
    %16 = arith.maximumf %14, %15 : vector<256x256xf32>
    %17 = arith.addf %9, %16 : vector<256x256xf32>
    %18 = arith.truncf %17 : vector<256x256xf32> to vector<256x256xbf16>
    %c0_14 = arith.constant 0 : index
    %c0_15 = arith.constant 0 : index
    %19 = vector.load %arg6[%c0_14, %c0_15] : memref<256x128xbf16, #tpu.memory_space<vmem>>, vector<256x128xbf16>
    %cst_16 = arith.constant dense<0.000000e+00> : vector<256x128xf32>
    %20 = tpu.matmul %18, %19, %cst_16 {dimension_numbers = #tpu.dot_dimension_numbers<[1], [0], [0], [1], [0, 0, 1, 1], [], []>} : vector<256x256xbf16>, vector<256x128xbf16>, vector<256x128xf32> -> vector<256x128xf32>
    %21 = vector.broadcast %3 : vector<1x128xf32> to vector<256x128xf32>
    %22 = arith.addf %20, %21 : vector<256x128xf32>
    %23 = arith.truncf %22 : vector<256x128xf32> to vector<256x128xbf16>
    %c0_17 = arith.constant 0 : index
    %c0_18 = arith.constant 0 : index
    %24 = vector.load %arg8[%c0_17, %c0_18] : memref<256x128xbf16, #tpu.memory_space<vmem>>, vector<256x128xbf16>
    tpu.vector_store %arg8[%c0_17, %c0_18], %23 {strides = array<i32>} : memref<256x128xbf16, #tpu.memory_space<vmem>>, vector<256x128xbf16>,
    return
  }
  func.func @transform_0(%arg0: i32) -> (i32, i32) {
    %c0_i32 = arith.constant 0 : i32
    %c0_i32_0 = arith.constant 0 : i32
    return %arg0, %c0_i32 : i32, i32
  }
  func.func @transform_1(%arg0: i32) -> (i32, i32) {
    %c0_i32 = arith.constant 0 : i32
    %c0_i32_0 = arith.constant 0 : i32
    %c0_i32_1 = arith.constant 0 : i32
    return %c0_i32, %c0_i32_0 : i32, i32
  }
  func.func @transform_2(%arg0: i32) -> (i32, i32) {
    %c0_i32 = arith.constant 0 : i32
    %c0_i32_0 = arith.constant 0 : i32
    %c0_i32_1 = arith.constant 0 : i32
    return %c0_i32, %c0_i32_0 : i32, i32
  }
  func.func @transform_3(%arg0: i32) -> (i32, i32) {
    %c0_i32 = arith.constant 0 : i32
    %c0_i32_0 = arith.constant 0 : i32
    %c0_i32_1 = arith.constant 0 : i32
    return %c0_i32, %c0_i32_0 : i32, i32
  }
  func.func @transform_4(%arg0: i32) -> (i32, i32) {
    %c0_i32 = arith.constant 0 : i32
    %c0_i32_0 = arith.constant 0 : i32
    %c0_i32_1 = arith.constant 0 : i32
    return %c0_i32, %c0_i32_0 : i32, i32
  }
  func.func @transform_5(%arg0: i32) -> (i32, i32) {
    %c0_i32 = arith.constant 0 : i32
    %c0_i32_0 = arith.constant 0 : i32
    %c0_i32_1 = arith.constant 0 : i32
    return %c0_i32, %c0_i32_0 : i32, i32
  }
  func.func @transform_6(%arg0: i32) -> (i32, i32) {
    %c0_i32 = arith.constant 0 : i32
    %c0_i32_0 = arith.constant 0 : i32
    %c0_i32_1 = arith.constant 0 : i32
    return %c0_i32, %c0_i32_0 : i32, i32
  }
  func.func @transform_7(%arg0: i32) -> (i32, i32) {
    %c0_i32 = arith.constant 0 : i32
    %c0_i32_0 = arith.constant 0 : i32
    return %arg0, %c0_i32 : i32, i32
  }
}

</mosaic_0001>

<bundles_post_ra>
// kernel: tpu_custom_call.1
= control target key start
LH: loop header
LB: loop body
LE: loop exit
PB: predicated region body
PF: predicated region fallthrough
CT: control target
= control target key end

     0   :  { %12 = vsyncpa [#allocation3], 0  ;;  %s3033_s0 = inlined_call_operand.hbm [shape: bf16[256,128], index: 0, kind: input, shape index: {}]   ;;  %s3034_s1 = inlined_call_operand.hbm [shape: bf16[128,256], index: 1, kind: input, shape index: {}]   ;;  %s3035_s2 = inlined_call_operand.vmem [shape: f32[1,256], index: 2, kind: input, shape index: {}]   ;;  %s3036_s3 = inlined_call_operand.hbm [shape: bf16[256,256], index: 3, kind: input, shape index: {}]   ;;  %s3037_s4 = inlined_call_operand.vmem [shape: f32[1,256], index: 4, kind: input, shape index: {}]   ;;  %s3038_s5 = inlined_call_operand.hbm [shape: bf16[256,128], index: 5, kind: input, shape index: {}]   ;;  %s3039_s6 = inlined_call_operand.vmem [shape: f32[1,128], index: 6, kind: input, shape index: {}]   ;;  %s3040_s7 = inlined_call_operand.hbm [shape: bf16[256,128], index: 7, kind: output, shape index: {}]  }
   0x1   :  { %13 = vsyncpa [#allocation6], 0 }
   0x2   :  { %14 = vsyncpa [#allocation9], 0 }
   0x3   :  { %15 = vsyncpa [#allocation4], 0  ;;  %s2240_s24 = smov [#allocation5]   ;;  %s2122_s28 = scalar_lea.hbm %s3034_s1, 2048 }
   0x4   :  { %s33_s25 = sshll.u32 %s2240_s24, 4  ;;  %p2123_p0 = scmp.ne.s32.totalorder %s3034_s1, %s2122_s28  ;;  %s34_s25 = int_to_ptr.vmem [resolvable:$true] %s33_s25 }
   0x5   :  { %p2126_p1 = scmp.lt.u32.totalorder %s2122_s28, %s3034_s1 }
   0x7   :  { %p2128_p2 = pnand %p2126_p1, %p2123_p0 }
   0x9   :  { %2131 = shalt.err (!%p2128_p2)
}
   0xa   :  { %s2132_s10 = scalar_lea.vmem %s34_s25, 2048  ;;  %p2137_p4 = scmp.lt.s32.totalorder %s34_s25, %s34_s25 }
   0xb   :  { %p2133_p3 = scmp.ne.s32.totalorder %s34_s25, %s2132_s10  ;;  %p2138_p5 = scmp.lt.s32.totalorder %s2132_s10, %s2132_s10 }
   0xd   :  { %p2139_p6 = por %p2138_p5, %p2137_p4 }
   0xf   :  { %p2140_p7 = pnand %p2139_p6, %p2133_p3 }
  0x11   :  { %2143 = shalt.err (!%p2140_p7)
}
  0x12   :  { %s2241_s11 = smov 128   ;;  %s2242_s12 = smov 8  }
  0x13   :  { %39 = dma.hbm_to_vmem [thread:$0]  %s3034_s1, 2048, %s34_s25, [#allocation6], %s2241_s11, %s2241_s11, %s2242_s12  }
  0x14   :  { %s2243_s15 = smov [#allocation2]   ;;  %s2144_s19 = scalar_lea.hbm %s3033_s0, 2048 }
  0x15   :  { %s21_s16 = sshll.u32 %s2243_s15, 4  ;;  %p2145_p8 = scmp.ne.s32.totalorder %s3033_s0, %s2144_s19  ;;  %s22_s16 = int_to_ptr.vmem [resolvable:$true] %s21_s16 }
  0x16   :  { %p2148_p9 = scmp.lt.u32.totalorder %s2144_s19, %s3033_s0 }
  0x18   :  { %p2150_p10 = pnand %p2148_p9, %p2145_p8 }
  0x1a   :  { %2153 = shalt.err (!%p2150_p10)
}
  0x1b   :  { %s2154_s24 = scalar_lea.vmem %s22_s16, 2048  ;;  %p2159_p12 = scmp.lt.s32.totalorder %s22_s16, %s22_s16 }
  0x1c   :  { %p2155_p11 = scmp.ne.s32.totalorder %s22_s16, %s2154_s24  ;;  %p2160_p13 = scmp.lt.s32.totalorder %s2154_s24, %s2154_s24 }
  0x1e   :  { %p2161_p0 = por %p2160_p13, %p2159_p12 }
  0x20   :  { %p2162_p1 = pnand %p2161_p0, %p2155_p11 }
  0x22   :  { %2165 = shalt.err (!%p2162_p1)
}
  0x23   :  { %s2244_s1 = smov 64   ;;  %s2245_s25 = smov 4  }
  0x24   :  { %27 = dma.hbm_to_vmem [thread:$0]  %s3033_s0, 2048, %s22_s16, [#allocation3], %s2244_s1, %s2244_s1, %s2245_s25  }
  0x25   :  { %s2246_s28 = smov [#allocation7]   ;;  %s2247_s30 = smov [#allocation8]  }
  0x26   :  { %s47_s29 = sshll.u32 %s2246_s28, 4  ;;  %s61_s8 = sshll.u32 %s2247_s30, 4  ;;  %s48_s29 = int_to_ptr.vmem [resolvable:$true] %s47_s29  ;;  %s2320_s8 = int_to_ptr.vmem [resolvable:$true] %s61_s8 }
  0x27   :  { %s2166_s13 = scalar_lea.hbm %s3036_s3, 4096 }
  0x28   :  { %p2167_p2 = scmp.ne.s32.totalorder %s3036_s3, %s2166_s13  ;;  %p2170_p3 = scmp.lt.u32.totalorder %s2166_s13, %s3036_s3 }
  0x2a   :  { %p2172_p4 = pnand %p2170_p3, %p2167_p2 }
  0x2c   :  { %2175 = shalt.err (!%p2172_p4)
}
  0x2d   :  { %s2176_s0 = scalar_lea.vmem %s48_s29, 4096  ;;  %p2181_p6 = scmp.lt.s32.totalorder %s48_s29, %s48_s29 }
  0x2e   :  { %p2177_p5 = scmp.ne.s32.totalorder %s48_s29, %s2176_s0  ;;  %p2182_p7 = scmp.lt.s32.totalorder %s2176_s0, %s2176_s0 }
  0x30   :  { %p2183_p8 = por %p2182_p7, %p2181_p6 }
  0x32   :  { %p2184_p9 = pnand %p2183_p8, %p2177_p5 }
  0x34   :  { %2187 = shalt.err (!%p2184_p9)
}
  0x35   :  { %53 = dma.hbm_to_vmem [thread:$0]  %s3036_s3, 4096, %s48_s29, [#allocation6], %s2241_s11, %s2241_s11, %s2242_s12  }
  0x36   :  { %s2188_s22 = scalar_lea.hbm %s3038_s5, 2048 }
  0x37   :  { %p2189_p10 = scmp.ne.s32.totalorder %s3038_s5, %s2188_s22  ;;  %p2192_p11 = scmp.lt.u32.totalorder %s2188_s22, %s3038_s5 }
  0x39   :  { %p2194_p12 = pnand %p2192_p11, %p2189_p10 }
  0x3b   :  { %2197 = shalt.err (!%p2194_p12)
}
  0x3c   :  { %s2198_s28 = scalar_lea.vmem %s2320_s8, 2048  ;;  %p2203_p0 = scmp.lt.s32.totalorder %s2320_s8, %s2320_s8 }
  0x3d   :  { %p2199_p13 = scmp.ne.s32.totalorder %s2320_s8, %s2198_s28  ;;  %p2204_p1 = scmp.lt.s32.totalorder %s2198_s28, %s2198_s28 }
  0x3f   :  { %p2205_p2 = por %p2204_p1, %p2203_p0 }
  0x41   :  { %p2206_p3 = pnand %p2205_p2, %p2199_p13 }
  0x43   :  { %2209 = shalt.err (!%p2206_p3)
}
  0x44   :  { %67 = dma.hbm_to_vmem [thread:$0]  %s3038_s5, 2048, %s2320_s8, [#allocation9], %s2244_s1, %s2244_s1, %s2245_s25  }
  0x45   :  { %2232 = dma.done.wait [#allocation3], 2048  }
  0x46   :  { %2233 = vsyncadd [#allocation3], 4294965248 }
  0x47   :  { %2234 = dma.done.wait [#allocation6], 6144  }
  0x48   :  { %2235 = vsyncadd [#allocation6], 4294961152 }
  0x49   :  { %2236 = dma.done.wait [#allocation9], 2048  }
  0x4a   :  { %2237 = vsyncadd [#allocation9], 4294965248  ;;  %v2248_v0 = vmov 0   ;;  %v2018_v1 = vld [vmem:[#allocation5 + $0x4] ss:$8 sps:$4 sm:$0xff]   ;;  %v2044_v28 = vld [vmem:[#allocation2 + $0x10] sm:$0xff]  }
  0x4b   :  { %353 = vmatprep.mubr.bf16.mxu0 %v2248_v0  ;;  %433 = vmatprep.mubr.bf16.mxu1 %v2248_v0  ;;  %v2020_v2 = vld [vmem:[#allocation5] ss:$8 sps:$4 sm:$0xff]   ;;  %v2021_v3 = vld [vmem:[#allocation5 + $0x14] ss:$8 sps:$4 sm:$0xff]   ;;  %v2023_v4 = vld [vmem:[#allocation5 + $0x10] ss:$8 sps:$4 sm:$0xff]  }
  0x4c   :  { %321 = vmatprep.subr.bf16.mxu0 %v2018_v1  ;;  %1992 = vmatprep.subr.bf16.mxu1 %v2018_v1  ;;  %v2024_v5 = vld [vmem:[#allocation5 + $0x24] ss:$8 sps:$4 sm:$0xff]   ;;  %v2026_v6 = vld [vmem:[#allocation5 + $0x20] ss:$8 sps:$4 sm:$0xff]   ;;  %v2027_v7 = vld [vmem:[#allocation5 + $0x34] ss:$8 sps:$4 sm:$0xff]  }
  0x4d   :  { %322 = vmatpush1.bf16.msra.mxu0 %v2020_v2  ;;  %2000 = vmatpush1.bf16.msra.mxu1 %v2020_v2  ;;  %v2029_v8 = vld [vmem:[#allocation5 + $0x30] ss:$8 sps:$4 sm:$0xff]   ;;  %v2030_v9 = vld [vmem:[#allocation5 + $0x44] ss:$8 sps:$4 sm:$0xff]   ;;  %v2032_v10 = vld [vmem:[#allocation5 + $0x40] ss:$8 sps:$4 sm:$0xff]   ;;  %v135_v2 = vlaneseq }
  0x4e   :  { %323 = vmatprep.subr.bf16.mxu0 %v2021_v3  ;;  %1993 = vmatprep.subr.bf16.mxu1 %v2021_v3  ;;  %v2033_v11 = vld [vmem:[#allocation5 + $0x54] ss:$8 sps:$4 sm:$0xff]   ;;  %v2035_v12 = vld [vmem:[#allocation5 + $0x50] ss:$8 sps:$4 sm:$0xff]   ;;  %v2036_v13 = vld [vmem:[#allocation5 + $0x64] ss:$8 sps:$4 sm:$0xff]  }
  0x4f   :  { %v2038_v14 = vld [vmem:[#allocation5 + $0x60] ss:$8 sps:$4 sm:$0xff]   ;;  %v2039_v15 = vld [vmem:[#allocation5 + $0x74] ss:$8 sps:$4 sm:$0xff]   ;;  %v2041_v16 = vld [vmem:[#allocation5 + $0x70] ss:$8 sps:$4 sm:$0xff]  }
  0x50   :  { %v2060_v17 = vld [vmem:[#allocation7 + $0x4] ss:$8 sps:$4 sm:$0xff]   ;;  %v2058_v20 = vld [vmem:[#allocation7] ss:$8 sps:$4 sm:$0xff]   ;;  %v2063_v21 = vld [vmem:[#allocation7 + $0x14] ss:$8 sps:$4 sm:$0xff]  }
  0x51   :  { %324 = vmatpush1.bf16.msra.mxu0 %v2023_v4  ;;  %2001 = vmatpush1.bf16.msra.mxu1 %v2023_v4  ;;  %v2042_v18 = vld [vmem:[#allocation2] sm:$0xff]   ;;  %v2061_v22 = vld [vmem:[#allocation7 + $0x10] ss:$8 sps:$4 sm:$0xff]   ;;  %v2043_v24 = vld [vmem:[#allocation2 + $0x8] sm:$0xff]   ;;  %v2373_v3 = vshrl.u32 %v135_v2, 7 }
  0x52   :  { %325 = vmatprep.subr.bf16.mxu0 %v2024_v5  ;;  %1994 = vmatprep.subr.bf16.mxu1 %v2024_v5  ;;  %v2050_v19 = vld [vmem:[#allocation2 + $0x40] sm:$0xff]   ;;  %v2051_v25 = vld [vmem:[#allocation2 + $0x48] sm:$0xff]   ;;  %v2069_v27 = vld [vmem:[#allocation7 + $0x34] ss:$8 sps:$4 sm:$0xff]  }
  0x53   :  { %v2066_v23 = vld [vmem:[#allocation7 + $0x24] ss:$8 sps:$4 sm:$0xff]   ;;  %v2064_v26 = vld [vmem:[#allocation7 + $0x20] ss:$8 sps:$4 sm:$0xff]   ;;  %v2067_v29 = vld [vmem:[#allocation7 + $0x30] ss:$8 sps:$4 sm:$0xff]  }
  0x54   :  { %v2052_v30 = vld [vmem:[#allocation2 + $0x50] sm:$0xff]   ;;  %v2072_v31 = vld [vmem:[#allocation7 + $0x44] ss:$8 sps:$4 sm:$0xff]   ;;  %v2070_v32 = vld [vmem:[#allocation7 + $0x40] ss:$8 sps:$4 sm:$0xff]   ;;  %v3062_v5 = vsub.s32 0, %v2373_v3 }
  0x55   :  { %326 = vmatpush1.bf16.msra.mxu0 %v2026_v6  ;;  %2002 = vmatpush1.bf16.msra.mxu1 %v2026_v6  ;;  %v2075_v33 = vld [vmem:[#allocation7 + $0x54] ss:$8 sps:$4 sm:$0xff]   ;;  %v2073_v34 = vld [vmem:[#allocation7 + $0x50] ss:$8 sps:$4 sm:$0xff]   ;;  %v2078_v35 = vld [vmem:[#allocation7 + $0x64] ss:$8 sps:$4 sm:$0xff]  }
  0x56   :  { %327 = vmatprep.subr.bf16.mxu0 %v2027_v7  ;;  %1995 = vmatprep.subr.bf16.mxu1 %v2027_v7  ;;  %v2045_v36 = vld [vmem:[#allocation2 + $0x18] sm:$0xff]   ;;  %v2076_v38 = vld [vmem:[#allocation7 + $0x60] ss:$8 sps:$4 sm:$0xff]   ;;  %v2084_v41 = vld [vmem:[#allocation7 + $0x84] ss:$8 sps:$4 sm:$0xff]  }
  0x57   :  { %v2053_v37 = vld [vmem:[#allocation2 + $0x58] sm:$0xff]   ;;  %v2046_v42 = vld [vmem:[#allocation2 + $0x20] sm:$0xff]   ;;  %v2047_v48 = vld [vmem:[#allocation2 + $0x28] sm:$0xff]  }
  0x58   :  { %v2081_v39 = vld [vmem:[#allocation7 + $0x74] ss:$8 sps:$4 sm:$0xff]   ;;  %v2079_v40 = vld [vmem:[#allocation7 + $0x70] ss:$8 sps:$4 sm:$0xff]   ;;  %v2054_v43 = vld [vmem:[#allocation2 + $0x60] sm:$0xff]  }
  0x59   :  { %328 = vmatpush1.bf16.msra.mxu0 %v2029_v8  ;;  %2003 = vmatpush1.bf16.msra.mxu1 %v2029_v8  ;;  %v2082_v44 = vld [vmem:[#allocation7 + $0x80] ss:$8 sps:$4 sm:$0xff]   ;;  %v2087_v45 = vld [vmem:[#allocation7 + $0x94] ss:$8 sps:$4 sm:$0xff]   ;;  %v2085_v46 = vld [vmem:[#allocation7 + $0x90] ss:$8 sps:$4 sm:$0xff]  }
  0x5a   :  { %329 = vmatprep.subr.bf16.mxu0 %v2030_v9  ;;  %1996 = vmatprep.subr.bf16.mxu1 %v2030_v9  ;;  %v2090_v47 = vld [vmem:[#allocation7 + $0xa4] ss:$8 sps:$4 sm:$0xff]   ;;  %v2088_v50 = vld [vmem:[#allocation7 + $0xa0] ss:$8 sps:$4 sm:$0xff]   ;;  %v2093_v51 = vld [vmem:[#allocation7 + $0xb4] ss:$8 sps:$4 sm:$0xff]  }
  0x5b   :  { %v2055_v49 = vld [vmem:[#allocation2 + $0x68] sm:$0xff]   ;;  %v2091_v52 = vld [vmem:[#allocation7 + $0xb0] ss:$8 sps:$4 sm:$0xff]   ;;  %v2099_v57 = vld [vmem:[#allocation7 + $0xd4] ss:$8 sps:$4 sm:$0xff]  }
  0x5c   :  { %v2096_v53 = vld [vmem:[#allocation7 + $0xc4] ss:$8 sps:$4 sm:$0xff]   ;;  %v2048_v54 = vld [vmem:[#allocation2 + $0x30] sm:$0xff]   ;;  %v2094_v56 = vld [vmem:[#allocation7 + $0xc0] ss:$8 sps:$4 sm:$0xff]  }
  0x5d   :  { %330 = vmatpush1.bf16.msra.mxu0 %v2032_v10  ;;  %2004 = vmatpush1.bf16.msra.mxu1 %v2032_v10  ;;  %v2056_v55 = vld [vmem:[#allocation2 + $0x70] sm:$0xff]   ;;  %v2049_v59 = vld [vmem:[#allocation2 + $0x38] sm:$0xff]   ;;  %v2102_v61 = vld [vmem:[#allocation7 + $0xe4] ss:$8 sps:$4 sm:$0xff]  }
  0x5e   :  { %331 = vmatprep.subr.bf16.mxu0 %v2033_v11  ;;  %1997 = vmatprep.subr.bf16.mxu1 %v2033_v11  ;;  %v2097_v58 = vld [vmem:[#allocation7 + $0xd0] ss:$8 sps:$4 sm:$0xff]   ;;  %v2100_v62 = vld [vmem:[#allocation7 + $0xe0] ss:$8 sps:$4 sm:$0xff]   ;;  %v2105_v63 = vld [vmem:[#allocation7 + $0xf4] ss:$8 sps:$4 sm:$0xff]  }
  0x5f   :  { %v2057_v60 = vld [vmem:[#allocation2 + $0x78] sm:$0xff]   ;;  %v115_v4 = vld [vmem:[%s3035_s2] sm:$0x3] }
  0x60   :  { %v2103_v1 = vld [vmem:[#allocation7 + $0xf0] ss:$8 sps:$4 sm:$0xff]   ;;  %v2386_v7 = vrot.slane %v115_v4, %v3062_v5 }
  0x61   :  { %332 = vmatpush1.bf16.msra.mxu0 %v2035_v12  ;;  %2005 = vmatpush1.bf16.msra.mxu1 %v2035_v12 }
  0x62   :  { %333 = vmatprep.subr.bf16.mxu0 %v2036_v13  ;;  %1998 = vmatprep.subr.bf16.mxu1 %v2036_v13 }
  0x65   :  { %334 = vmatpush1.bf16.msra.mxu0 %v2038_v14  ;;  %2006 = vmatpush1.bf16.msra.mxu1 %v2038_v14 }
  0x66   :  { %335 = vmatprep.subr.bf16.mxu0 %v2039_v15  ;;  %1999 = vmatprep.subr.bf16.mxu1 %v2039_v15 }
  0x69   :  { %336 = vmatpush1.bf16.msra.mxu0 %v2041_v16  ;;  %2007 = vmatpush1.bf16.msra.mxu1 %v2041_v16 }
  0x6a   :  { %813 = vmatprep.subr.bf16.mxu1 %v2060_v17 }
  0x6c   :  { %354 = vmatmul.mubr.bf16.vlgmr.msra.gmra.mrb[0].mxu0 %v2042_v18  ;;  %434 = vmatmul.mubr.bf16.vlgmr.msra.gmra.mrb[0].mxu1 %v2050_v19 }
  0x6d   :  { %363 = vmatprep.mubr.bf16.mxu0 %v2248_v0  ;;  %443 = vmatprep.mubr.bf16.mxu1 %v2248_v0 }
  0x6e   :  { %814 = vmatpush1.bf16.msra.mxu1 %v2058_v20 }
  0x6f   :  { %815 = vmatprep.subr.bf16.mxu1 %v2063_v21  ;;  %v2106_v21 = vld [vmem:[#allocation8 + $0x40] sm:$0xff]  }
  0x70   :  { %1880 = vmatprep.subr.bf16.mxu0 %v2106_v21 }
  0x72   :  { %816 = vmatpush1.bf16.msra.mxu1 %v2061_v22  ;;  %v2107_v22 = vld [vmem:[#allocation8] sm:$0xff]  }
  0x73   :  { %817 = vmatprep.subr.bf16.mxu1 %v2066_v23  ;;  %1881 = vmatpush3.bf16.msra.mxu0 %v2107_v22  ;;  %v2116_v22 = vld [vmem:[#allocation8 + $0x68] sm:$0xff]  }
  0x74   :  { %364 = vmatmul.mubr.bf16.gmra.mrb[4].mxu0 %v2043_v24  ;;  %444 = vmatmul.mubr.bf16.gmra.mrb[4].mxu1 %v2051_v25  ;;  %v2108_v24 = vld [vmem:[#allocation8 + $0x48] sm:$0xff]  }
  0x75   :  { %373 = vmatprep.mubr.bf16.mxu0 %v2248_v0  ;;  %453 = vmatprep.mubr.bf16.mxu1 %v2248_v0 }
  0x76   :  { %818 = vmatpush1.bf16.msra.mxu1 %v2064_v26  ;;  %1882 = vmatprep.subr.bf16.mxu0 %v2108_v24 }
  0x77   :  { %819 = vmatprep.subr.bf16.mxu1 %v2069_v27 }
  0x7a   :  { %820 = vmatpush1.bf16.msra.mxu1 %v2067_v29 }
  0x7b   :  { %821 = vmatprep.subr.bf16.mxu1 %v2072_v31 }
  0x7c   :  { %374 = vmatmul.mubr.bf16.gmra.mrb[8].mxu0 %v2044_v28  ;;  %454 = vmatmul.mubr.bf16.gmra.mrb[8].mxu1 %v2052_v30  ;;  %v2109_v28 = vld [vmem:[#allocation8 + $0x8] sm:$0xff]   ;;  %v2110_v30 = vld [vmem:[#allocation8 + $0x50] sm:$0xff]  }
  0x7d   :  { %383 = vmatprep.mubr.bf16.mxu0 %v2248_v0  ;;  %463 = vmatprep.mubr.bf16.mxu1 %v2248_v0 }
  0x7e   :  { %822 = vmatpush1.bf16.msra.mxu1 %v2070_v32  ;;  %1883 = vmatpush3.bf16.msra.mxu0 %v2109_v28 }
  0x7f   :  { %823 = vmatprep.subr.bf16.mxu1 %v2075_v33  ;;  %1884 = vmatprep.subr.bf16.mxu0 %v2110_v30 }
  0x82   :  { %824 = vmatpush1.bf16.msra.mxu1 %v2073_v34 }
  0x83   :  { %825 = vmatprep.subr.bf16.mxu1 %v2078_v35 }
  0x84   :  { %384 = vmatmul.mubr.bf16.gmra.mrb[12].mxu0 %v2045_v36  ;;  %464 = vmatmul.mubr.bf16.gmra.mrb[12].mxu1 %v2053_v37 }
  0x85   :  { %393 = vmatprep.mubr.bf16.mxu0 %v2248_v0  ;;  %473 = vmatprep.mubr.bf16.mxu1 %v2248_v0 }
  0x86   :  { %826 = vmatpush1.bf16.msra.mxu1 %v2076_v38 }
  0x87   :  { %827 = vmatprep.subr.bf16.mxu1 %v2081_v39 }
  0x8a   :  { %828 = vmatpush1.bf16.msra.mxu1 %v2079_v40 }
  0x8b   :  { %829 = vmatprep.subr.bf16.mxu1 %v2084_v41 }
  0x8c   :  { %394 = vmatmul.mubr.bf16.gmra.mrb[16].mxu0 %v2046_v42  ;;  %474 = vmatmul.mubr.bf16.gmra.mrb[16].mxu1 %v2054_v43  ;;  %v2111_v42 = vld [vmem:[#allocation8 + $0x10] sm:$0xff]  }
  0x8d   :  { %403 = vmatprep.mubr.bf16.mxu0 %v2248_v0  ;;  %483 = vmatprep.mubr.bf16.mxu1 %v2248_v0 }
  0x8e   :  { %830 = vmatpush1.bf16.msra.mxu1 %v2082_v44  ;;  %1885 = vmatpush3.bf16.msra.mxu0 %v2111_v42 }
  0x8f   :  { %831 = vmatprep.subr.bf16.mxu1 %v2087_v45 }
  0x92   :  { %832 = vmatpush1.bf16.msra.mxu1 %v2085_v46 }
  0x93   :  { %833 = vmatprep.subr.bf16.mxu1 %v2090_v47 }
  0x94   :  { %404 = vmatmul.mubr.bf16.gmra.mrb[20].mxu0 %v2047_v48  ;;  %484 = vmatmul.mubr.bf16.gmra.mrb[20].mxu1 %v2055_v49  ;;  %v2112_v48 = vld [vmem:[#allocation8 + $0x58] sm:$0xff]  }
  0x95   :  { %413 = vmatprep.mubr.bf16.mxu0 %v2248_v0  ;;  %493 = vmatprep.mubr.bf16.mxu1 %v2248_v0 }
  0x96   :  { %834 = vmatpush1.bf16.msra.mxu1 %v2088_v50  ;;  %1886 = vmatprep.subr.bf16.mxu0 %v2112_v48 }
  0x97   :  { %835 = vmatprep.subr.bf16.mxu1 %v2093_v51 }
  0x9a   :  { %836 = vmatpush1.bf16.msra.mxu1 %v2091_v52 }
  0x9b   :  { %837 = vmatprep.subr.bf16.mxu1 %v2096_v53 }
  0x9c   :  { %414 = vmatmul.mubr.bf16.gmra.mrb[24].mxu0 %v2048_v54  ;;  %494 = vmatmul.mubr.bf16.gmra.mrb[24].mxu1 %v2056_v55  ;;  %v2113_v54 = vld [vmem:[#allocation8 + $0x18] sm:$0xff]  }
  0x9d   :  { %423 = vmatprep.mubr.bf16.mxu0 %v2248_v0  ;;  %503 = vmatprep.mubr.bf16.mxu1 %v2248_v0  ;;  %v3061_v0 = vsub.s32 1, %v2373_v3 }
  0x9e   :  { %838 = vmatpush1.bf16.msra.mxu1 %v2094_v56  ;;  %v2114_v56 = vld [vmem:[#allocation8 + $0x60] sm:$0xff]   ;;  %1887 = vmatpush3.bf16.msra.mxu0 %v2113_v54 }
  0x9f   :  { %839 = vmatprep.subr.bf16.mxu1 %v2099_v57  ;;  %v2382_v6 = vrot.slane %v115_v4, %v3061_v0  ;;  %1888 = vmatprep.subr.bf16.mxu0 %v2114_v56 }
  0xa2   :  { %840 = vmatpush1.bf16.msra.mxu1 %v2097_v58 }
  0xa3   :  { %841 = vmatprep.subr.bf16.mxu1 %v2102_v61 }
  0xa4   :  { %424 = vmatmul.mubr.bf16.gmra.mrb[28].mxu0 %v2049_v59  ;;  %504 = vmatmul.mubr.bf16.gmra.mrb[28].mxu1 %v2057_v60 }
  0xa6   :  { %842 = vmatpush1.bf16.msra.mxu1 %v2100_v62 }
  0xa7   :  { %843 = vmatprep.subr.bf16.mxu1 %v2105_v63 }
  0xaa   :  { %844 = vmatpush1.bf16.msra.mxu1 %v2103_v1 }
 0x13f   :  { %v355_v8 = vpop.f32.mrb[0].mxu0  ;;  %v435_v9 = vpop.f32.mrb[0].mxu1 }
 0x140   :  { %v357_v10 = vpop.f32.mrb[1].mxu0  ;;  %v2389_v11 = vadd.f32 %v435_v9, %v2386_v7  ;;  %v2391_v12 = vpop.f32.mrb[1].mxu1  ;;  %v2397_v16 = vadd.f32 %v355_v8, %v2386_v7  ;;  %v2115_v9 = vld [vmem:[#allocation8 + $0x20] sm:$0xff]  }
 0x141   :  { %v2394_v13 = vadd.f32 %v357_v10, %v2382_v6  ;;  %v359_v14 = vpop.f32.mrb[2].mxu0  ;;  %v439_v15 = vpop.f32.mrb[2].mxu1  ;;  %1889 = vmatpush3.bf16.msra.mxu0 %v2115_v9 }
 0x142   :  { %v2400_v17 = vadd.f32 %v359_v14, %v2386_v7  ;;  %v361_v18 = vpop.f32.mrb[3].mxu0  ;;  %v2403_v19 = vadd.f32 %v439_v15, %v2386_v7  ;;  %v2405_v20 = vpop.f32.mrb[3].mxu1  ;;  %v3060_v29 = vmax.f32 %v2397_v16, 0.0  ;;  %1890 = vmatprep.subr.bf16.mxu0 %v2116_v22 }
 0x143   :  { %v2408_v23 = vadd.f32 %v361_v18, %v2382_v6  ;;  %v3058_v26 = vmax.f32 %v2394_v13, 0.0 }
 0x144   :  { %v3059_v25 = vmax.f32 %v2400_v17, 0.0 }
 0x145   :  { %v3057_v27 = vmax.f32 %v2408_v23, 0.0 }
 0x146   :  { %v578_v34 = vpack.c.bf16 %v3059_v25, %v3060_v29 }
 0x147   :  { %v579_v31 = vpack.c.bf16 %v3057_v27, %v3058_v26  ;;  %v365_v32 = vpop.f32.mrb[4].mxu0  ;;  %v445_v33 = vpop.f32.mrb[4].mxu1 }
 0x148   :  { %v367_v35 = vpop.f32.mrb[5].mxu0  ;;  %v2423_v36 = vadd.f32 %v445_v33, %v2386_v7  ;;  %v447_v37 = vpop.f32.mrb[5].mxu1  ;;  %v2432_v43 = vadd.f32 %v365_v32, %v2386_v7  ;;  %v2117_v33 = vld [vmem:[#allocation8 + $0x28] sm:$0xff]  }
 0x149   :  { %v2426_v38 = vadd.f32 %v367_v35, %v2382_v6  ;;  %v369_v39 = vpop.f32.mrb[6].mxu0  ;;  %845 = vmatprep.mubr.bf16.mxu1 %v579_v31  ;;  %v2429_v40 = vadd.f32 %v447_v37, %v2382_v6  ;;  %v449_v41 = vpop.f32.mrb[6].mxu1  ;;  %v2118_v35 = vld [vmem:[#allocation8 + $0x70] sm:$0xff]   ;;  %1891 = vmatpush3.bf16.msra.mxu0 %v2117_v33 }
 0x14a   :  { %v2435_v44 = vadd.f32 %v369_v39, %v2386_v7  ;;  %v371_v45 = vpop.f32.mrb[7].mxu0  ;;  %846 = vmatmul.mubr.bf16.vlgmr.msra.gmra.mrb[32].mxu1 %v578_v34  ;;  %v2438_v46 = vadd.f32 %v449_v41, %v2386_v7  ;;  %v451_v47 = vpop.f32.mrb[7].mxu1  ;;  %v3054_v55 = vmax.f32 %v2432_v43, 0.0  ;;  %1892 = vmatprep.subr.bf16.mxu0 %v2118_v35 }
 0x14b   :  { %v2441_v49 = vadd.f32 %v371_v45, %v2382_v6  ;;  %v2444_v50 = vadd.f32 %v451_v47, %v2382_v6  ;;  %v3050_v52 = vmax.f32 %v2426_v38, 0.0 }
 0x14c   :  { %v3051_v51 = vmax.f32 %v2435_v44, 0.0 }
 0x14d   :  { %v3049_v53 = vmax.f32 %v2441_v49, 0.0 }
 0x14e   :  { %v580_v60 = vpack.c.bf16 %v3051_v51, %v3054_v55 }
 0x14f   :  { %v581_v57 = vpack.c.bf16 %v3049_v53, %v3050_v52  ;;  %v375_v58 = vpop.f32.mrb[8].mxu0  ;;  %v455_v59 = vpop.f32.mrb[8].mxu1 }
 0x150   :  { %v377_v61 = vpop.f32.mrb[9].mxu0  ;;  %v2459_v62 = vadd.f32 %v455_v59, %v2386_v7  ;;  %v457_v63 = vpop.f32.mrb[9].mxu1  ;;  %v2468_v10 = vadd.f32 %v375_v58, %v2386_v7  ;;  %v2119_v59 = vld [vmem:[#allocation8 + $0x30] sm:$0xff]  }
 0x151   :  { %v2462_v1 = vadd.f32 %v377_v61, %v2382_v6  ;;  %v379_v2 = vpop.f32.mrb[10].mxu0  ;;  %855 = vmatprep.mubr.bf16.mxu1 %v581_v57  ;;  %v2465_v4 = vadd.f32 %v457_v63, %v2382_v6  ;;  %v459_v8 = vpop.f32.mrb[10].mxu1  ;;  %1893 = vmatpush3.bf16.msra.mxu0 %v2119_v59 }
 0x152   :  { %v2471_v14 = vadd.f32 %v379_v2, %v2386_v7  ;;  %v381_v15 = vpop.f32.mrb[11].mxu0  ;;  %856 = vmatmul.mubr.bf16.gmra.mrb[36].mxu1 %v580_v60  ;;  %v2474_v18 = vadd.f32 %v459_v8, %v2386_v7  ;;  %v461_v21 = vpop.f32.mrb[11].mxu1  ;;  %v3048_v34 = vmax.f32 %v2468_v10, 0.0 }
 0x153   :  { %v2477_v24 = vadd.f32 %v381_v15, %v2382_v6  ;;  %v2480_v28 = vadd.f32 %v461_v21, %v2382_v6  ;;  %v3046_v31 = vmax.f32 %v2462_v1, 0.0 }
 0x154   :  { %v3047_v30 = vmax.f32 %v2471_v14, 0.0 }
 0x155   :  { %v3045_v32 = vmax.f32 %v2477_v24, 0.0 }
 0x156   :  { %v582_v42 = vpack.c.bf16 %v3047_v30, %v3048_v34 }
 0x157   :  { %v583_v37 = vpack.c.bf16 %v3045_v32, %v3046_v31  ;;  %v385_v39 = vpop.f32.mrb[12].mxu0  ;;  %v465_v41 = vpop.f32.mrb[12].mxu1 }
 0x158   :  { %v387_v45 = vpop.f32.mrb[13].mxu0  ;;  %v2495_v47 = vadd.f32 %v465_v41, %v2386_v7  ;;  %v467_v48 = vpop.f32.mrb[13].mxu1  ;;  %v2504_v60 = vadd.f32 %v385_v39, %v2386_v7 }
 0x159   :  { %v2498_v54 = vadd.f32 %v387_v45, %v2382_v6  ;;  %v389_v56 = vpop.f32.mrb[14].mxu0  ;;  %865 = vmatprep.mubr.bf16.mxu1 %v583_v37  ;;  %v2501_v57 = vadd.f32 %v467_v48, %v2382_v6  ;;  %v469_v58 = vpop.f32.mrb[14].mxu1 }
 0x15a   :  { %v2507_v61 = vadd.f32 %v389_v56, %v2386_v7  ;;  %v391_v63 = vpop.f32.mrb[15].mxu0  ;;  %866 = vmatmul.mubr.bf16.gmra.mrb[40].mxu1 %v582_v42  ;;  %v2510_v2 = vadd.f32 %v469_v58, %v2386_v7  ;;  %v471_v8 = vpop.f32.mrb[15].mxu1  ;;  %v3044_v37 = vmax.f32 %v2504_v60, 0.0 }
 0x15b   :  { %v2513_v9 = vadd.f32 %v391_v63, %v2382_v6  ;;  %v2516_v15 = vadd.f32 %v471_v8, %v2382_v6  ;;  %v3042_v22 = vmax.f32 %v2498_v54, 0.0 }
 0x15c   :  { %v3043_v21 = vmax.f32 %v2507_v61, 0.0 }
 0x15d   :  { %v3041_v33 = vmax.f32 %v2513_v9, 0.0 }
 0x15e   :  { %v584_v42 = vpack.c.bf16 %v3043_v21, %v3044_v37 }
 0x15f   :  { %v585_v35 = vpack.c.bf16 %v3041_v33, %v3042_v22  ;;  %v395_v39 = vpop.f32.mrb[16].mxu0  ;;  %v475_v41 = vpop.f32.mrb[16].mxu1 }
 0x160   :  { %v397_v45 = vpop.f32.mrb[17].mxu0  ;;  %v2531_v48 = vadd.f32 %v475_v41, %v2386_v7  ;;  %v477_v56 = vpop.f32.mrb[17].mxu1  ;;  %v2540_v33 = vadd.f32 %v395_v39, %v2386_v7 }
 0x161   :  { %v2534_v58 = vadd.f32 %v397_v45, %v2382_v6  ;;  %v399_v59 = vpop.f32.mrb[18].mxu0  ;;  %875 = vmatprep.mubr.bf16.mxu1 %v585_v35  ;;  %v2537_v63 = vadd.f32 %v477_v56, %v2382_v6  ;;  %v479_v8 = vpop.f32.mrb[18].mxu1 }
 0x162   :  { %v2543_v22 = vadd.f32 %v399_v59, %v2386_v7  ;;  %v401_v21 = vpop.f32.mrb[19].mxu0  ;;  %876 = vmatmul.mubr.bf16.gmra.mrb[44].mxu1 %v584_v42  ;;  %v2546_v41 = vadd.f32 %v479_v8, %v2386_v7  ;;  %v481_v37 = vpop.f32.mrb[19].mxu1  ;;  %v3056_v59 = vmax.f32 %v2540_v33, 0.0 }
 0x163   :  { %3127 = vst [vmem:[#allocation15_spill] sm:$0xff] %v2534_v58  ;;  %v2549_v45 = vadd.f32 %v401_v21, %v2382_v6  ;;  %v2552_v35 = vadd.f32 %v481_v37, %v2382_v6  ;;  %v3053_v39 = vmax.f32 %v2534_v58, 0.0 }
 0x164   :  { %3128 = vst [vmem:[#allocation16_spill] sm:$0xff] %v2543_v22  ;;  %v3055_v56 = vmax.f32 %v2543_v22, 0.0 }
 0x165   :  { %3129 = vst [vmem:[#allocation17_spill] sm:$0xff] %v2549_v45  ;;  %v3052_v32 = vmax.f32 %v2549_v45, 0.0 }
 0x166   :  { %v586_v21 = vpack.c.bf16 %v3055_v56, %v3056_v59 }
 0x167   :  { %v587_v42 = vpack.c.bf16 %v3052_v32, %v3053_v39  ;;  %v405_v8 = vpop.f32.mrb[20].mxu0  ;;  %v485_v31 = vpop.f32.mrb[20].mxu1 }
 0x168   :  { %v407_v37 = vpop.f32.mrb[21].mxu0  ;;  %v2567_v30 = vadd.f32 %v485_v31, %v2386_v7  ;;  %v487_v34 = vpop.f32.mrb[21].mxu1  ;;  %v2576_v39 = vadd.f32 %v405_v8, %v2386_v7 }
 0x169   :  { %v2570_v53 = vadd.f32 %v407_v37, %v2382_v6  ;;  %v409_v52 = vpop.f32.mrb[22].mxu0  ;;  %885 = vmatprep.mubr.bf16.mxu1 %v587_v42  ;;  %v2573_v51 = vadd.f32 %v487_v34, %v2382_v6  ;;  %v489_v32 = vpop.f32.mrb[22].mxu1 }
 0x16a   :  { %3131 = vst [vmem:[#allocation19_spill] sm:$0xff] %v2576_v39  ;;  %v2579_v55 = vadd.f32 %v409_v52, %v2386_v7  ;;  %v411_v56 = vpop.f32.mrb[23].mxu0  ;;  %886 = vmatmul.mubr.bf16.gmra.mrb[48].mxu1 %v586_v21  ;;  %v2582_v31 = vadd.f32 %v489_v32, %v2386_v7  ;;  %v491_v59 = vpop.f32.mrb[23].mxu1  ;;  %v3068_v52 = vmax.f32 %v2576_v39, 0.0 }
 0x16b   :  { %3130 = vst [vmem:[#allocation18_spill] sm:$0xff] %v2570_v53  ;;  %v2585_v37 = vadd.f32 %v411_v56, %v2382_v6  ;;  %v2588_v42 = vadd.f32 %v491_v59, %v2382_v6  ;;  %v3065_v8 = vmax.f32 %v2570_v53, 0.0 }
 0x16c   :  { %3132 = vst [vmem:[#allocation20_spill] sm:$0xff] %v2579_v55  ;;  %v3067_v34 = vmax.f32 %v2579_v55, 0.0 }
 0x16d   :  { %3133 = vst [vmem:[#allocation21_spill] sm:$0xff] %v2585_v37  ;;  %v3064_v27 = vmax.f32 %v2585_v37, 0.0 }
 0x16e   :  { %v588_v56 = vpack.c.bf16 %v3067_v34, %v3068_v52 }
 0x16f   :  { %v589_v32 = vpack.c.bf16 %v3064_v27, %v3065_v8  ;;  %v415_v21 = vpop.f32.mrb[24].mxu0  ;;  %v495_v26 = vpop.f32.mrb[24].mxu1 }
 0x170   :  { %v417_v59 = vpop.f32.mrb[25].mxu0  ;;  %v2603_v25 = vadd.f32 %v495_v26, %v2386_v7  ;;  %v497_v29 = vpop.f32.mrb[25].mxu1  ;;  %v2612_v8 = vadd.f32 %v415_v21, %v2386_v7 }
 0x171   :  { %v2606_v0 = vadd.f32 %v417_v59, %v2382_v6  ;;  %v419_v5 = vpop.f32.mrb[26].mxu0  ;;  %895 = vmatprep.mubr.bf16.mxu1 %v589_v32  ;;  %v2609_v37 = vadd.f32 %v497_v29, %v2382_v6  ;;  %v499_v27 = vpop.f32.mrb[26].mxu1 }
 0x172   :  { %3134 = vst [vmem:[#allocation22_spill] sm:$0xff] %v2603_v25  ;;  %3137 = vst [vmem:[#allocation25_spill] sm:$0xff] %v2612_v8  ;;  %v2615_v53 = vadd.f32 %v419_v5, %v2386_v7  ;;  %v421_v34 = vpop.f32.mrb[27].mxu0  ;;  %896 = vmatmul.mubr.bf16.gmra.mrb[52].mxu1 %v588_v56  ;;  %v2618_v26 = vadd.f32 %v499_v27, %v2386_v7  ;;  %v501_v52 = vpop.f32.mrb[27].mxu1  ;;  %v3079_v5 = vmax.f32 %v2612_v8, 0.0 }
 0x173   :  { %3135 = vst [vmem:[#allocation23_spill] sm:$0xff] %v2606_v0  ;;  %3136 = vst [vmem:[#allocation24_spill] sm:$0xff] %v2609_v37  ;;  %v2621_v59 = vadd.f32 %v421_v34, %v2382_v6  ;;  %v2624_v32 = vadd.f32 %v501_v52, %v2382_v6  ;;  %v3075_v21 = vmax.f32 %v2606_v0, 0.0  ;;  %v2636_v34 = vadd.f32 %v2391_v12, %v2382_v6 }
 0x174   :  { %3138 = vst [vmem:[#allocation26_spill] sm:$0xff] %v2615_v53  ;;  %3139 = vst [vmem:[#allocation27_spill] sm:$0xff] %v2618_v26  ;;  %v2640_v52 = vadd.f32 %v2405_v20, %v2382_v6  ;;  %v3142_v39 = vmax.f32 %v2615_v53, 0.0 }
 0x175   :  { %3140 = vst [vmem:[#allocation28_spill] sm:$0xff] %v2621_v59  ;;  %3141 = vst [vmem:[#allocation29_spill] sm:$0xff] %v2624_v32  ;;  %v3074_v55 = vmax.f32 %v2621_v59, 0.0 }
 0x176   :  { %v590_v45 = vpack.c.bf16 %v3142_v39, %v3079_v5 }
 0x177   :  { %v591_v27 = vpack.c.bf16 %v3074_v55, %v3075_v21  ;;  %v425_v56 = vpop.f32.mrb[28].mxu0  ;;  %v505_v29 = vpop.f32.mrb[28].mxu1 }
 0x178   :  { %v427_v58 = vpop.f32.mrb[29].mxu0  ;;  %v2647_v0 = vadd.f32 %v505_v29, %v2386_v7  ;;  %v507_v55 = vpop.f32.mrb[29].mxu1  ;;  %v2656_v22 = vadd.f32 %v425_v56, %v2386_v7 }
 0x179   :  { %v2650_v21 = vadd.f32 %v427_v58, %v2382_v6  ;;  %v429_v12 = vpop.f32.mrb[30].mxu0  ;;  %905 = vmatprep.mubr.bf16.mxu1 %v591_v27  ;;  %v2653_v59 = vadd.f32 %v507_v55, %v2382_v6  ;;  %v509_v20 = vpop.f32.mrb[30].mxu1  ;;  %v3085_v27 = vmax.f32 %v2636_v34, 0.0  ;;  %v3084_v55 = vmax.f32 %v2640_v52, 0.0 }
 0x17a   :  { %3143 = vst [vmem:[#allocation30_spill] sm:$0xff] %v2647_v0  ;;  %v2659_v53 = vadd.f32 %v429_v12, %v2386_v7  ;;  %v431_v39 = vpop.f32.mrb[31].mxu0  ;;  %906 = vmatmul.mubr.bf16.gmra.mrb[56].mxu1 %v590_v45  ;;  %v2662_v29 = vadd.f32 %v509_v20, %v2386_v7  ;;  %v511_v5 = vpop.f32.mrb[31].mxu1  ;;  %v3100_v7 = vmax.f32 %v2656_v22, 0.0 }
 0x17b   :  { %3144 = vst [vmem:[#allocation31_spill] sm:$0xff] %v2650_v21  ;;  %3145 = vst [vmem:[#allocation32_spill] sm:$0xff] %v2653_v59  ;;  %v2665_v58 = vadd.f32 %v431_v39, %v2382_v6  ;;  %v2670_v8 = vadd.f32 %v511_v5, %v2382_v6  ;;  %v3086_v12 = vmax.f32 %v2650_v21, 0.0  ;;  %v595_v39 = vpack.c.bf16 %v3084_v55, %v3085_v27 }
 0x17c   :  { %3146 = vst [vmem:[#allocation33_spill] sm:$0xff] %v2662_v29  ;;  %v3099_v56 = vmax.f32 %v2659_v53, 0.0  ;;  %v3088_v5 = vmax.f32 %v2429_v40, 0.0  ;;  %v3087_v21 = vmax.f32 %v2444_v50, 0.0  ;;  %v3094_v27 = vmax.f32 %v2423_v36, 0.0 }
 0x17d   :  { %3147 = vst [vmem:[#allocation34_spill] sm:$0xff] %v2665_v58  ;;  %3148 = vst [vmem:[#allocation35_spill] sm:$0xff] %v2670_v8  ;;  %v3083_v45 = vmax.f32 %v2665_v58, 0.0  ;;  %v3090_v58 = vmax.f32 %v2389_v11, 0.0 }
 0x17e   :  { %v592_v6 = vpack.c.bf16 %v3099_v56, %v3100_v7  ;;  %v597_v55 = vpack.c.bf16 %v3087_v21, %v3088_v5  ;;  %v2120_v56 = vld [vmem:[#allocation8 + $0x78] sm:$0xff]  }
 0x17f   :  { %v593_v20 = vpack.c.bf16 %v3083_v45, %v3086_v12  ;;  %v3089_v45 = vmax.f32 %v2403_v19, 0.0  ;;  %v3093_v12 = vmax.f32 %v2438_v46, 0.0  ;;  %v2121_v7 = vld [vmem:[#allocation8 + $0x38] sm:$0xff]   ;;  %1894 = vmatprep.subr.bf16.mxu0 %v2120_v56  ;;  %v3109_v56 = vmax.f32 %v2582_v31, 0.0 }
 0x180   :  { %1895 = vmatpush3.bf16.msra.mxu0 %v2121_v7 }
 0x181   :  { %915 = vmatprep.mubr.bf16.mxu1 %v593_v20  ;;  %v594_v20 = vpack.c.bf16 %v3089_v45, %v3090_v58  ;;  %v596_v5 = vpack.c.bf16 %v3093_v12, %v3094_v27  ;;  %v3098_v45 = vmax.f32 %v2459_v62, 0.0  ;;  %v3097_v58 = vmax.f32 %v2474_v18, 0.0 }
 0x182   :  { %916 = vmatmul.mubr.bf16.gmra.mrb[60].mxu1 %v592_v6  ;;  %v3092_v6 = vmax.f32 %v2465_v4, 0.0  ;;  %v3116_v12 = vmax.f32 %v2495_v47, 0.0  ;;  %v3103_v27 = vmax.f32 %v2510_v2, 0.0 }
 0x183   :  { %925 = vmatprep.mubr.bf16.mxu1 %v595_v39  ;;  %v3091_v39 = vmax.f32 %v2480_v28, 0.0 }
 0x185   :  { %v599_v21 = vpack.c.bf16 %v3091_v39, %v3092_v6  ;;  %v598_v6 = vpack.c.bf16 %v3097_v58, %v3098_v45  ;;  %v3115_v58 = vmax.f32 %v2531_v48, 0.0  ;;  %v3106_v45 = vmax.f32 %v2546_v41, 0.0 }
 0x18a   :  { %926 = vmatmul.mubr.bf16.gmra.mrb[64].mxu1 %v594_v20  ;;  %v3096_v20 = vmax.f32 %v2501_v57, 0.0 }
 0x18b   :  { %935 = vmatprep.mubr.bf16.mxu1 %v597_v55  ;;  %v3095_v55 = vmax.f32 %v2516_v15, 0.0 }
 0x18d   :  { %v601_v39 = vpack.c.bf16 %v3095_v55, %v3096_v20  ;;  %v600_v20 = vpack.c.bf16 %v3103_v27, %v3116_v12  ;;  %v3112_v27 = vmax.f32 %v2567_v30, 0.0 }
 0x192   :  { %936 = vmatmul.mubr.bf16.gmra.mrb[68].mxu1 %v596_v5  ;;  %v3102_v5 = vmax.f32 %v2537_v63, 0.0 }
 0x193   :  { %945 = vmatprep.mubr.bf16.mxu1 %v599_v21  ;;  %v3101_v21 = vmax.f32 %v2552_v35, 0.0 }
 0x195   :  { %v603_v55 = vpack.c.bf16 %v3101_v21, %v3102_v5  ;;  %v3107_v5 = vmax.f32 %v2624_v32, 0.0 }
 0x19a   :  { %946 = vmatmul.mubr.bf16.gmra.mrb[72].mxu1 %v598_v6  ;;  %v3105_v6 = vmax.f32 %v2573_v51, 0.0 }
 0x19b   :  { %955 = vmatprep.mubr.bf16.mxu1 %v601_v39  ;;  %v3104_v39 = vmax.f32 %v2588_v42, 0.0 }
 0x19d   :  { %v605_v21 = vpack.c.bf16 %v3104_v39, %v3105_v6  ;;  %v604_v39 = vpack.c.bf16 %v3109_v56, %v3112_v27  ;;  %v3114_v6 = vmax.f32 %v2603_v25, 0.0 }
 0x1a2   :  { %956 = vmatmul.mubr.bf16.gmra.mrb[76].mxu1 %v600_v20  ;;  %v602_v20 = vpack.c.bf16 %v3106_v45, %v3115_v58  ;;  %v3113_v45 = vmax.f32 %v2618_v26, 0.0 }
 0x1a3   :  { %965 = vmatprep.mubr.bf16.mxu1 %v603_v55  ;;  %v3108_v55 = vmax.f32 %v2609_v37, 0.0 }
 0x1a5   :  { %v607_v7 = vpack.c.bf16 %v3107_v5, %v3108_v55  ;;  %v606_v55 = vpack.c.bf16 %v3113_v45, %v3114_v6 }
 0x1aa   :  { %966 = vmatmul.mubr.bf16.gmra.mrb[80].mxu1 %v602_v20  ;;  %v3111_v20 = vmax.f32 %v2653_v59, 0.0 }
 0x1ab   :  { %975 = vmatprep.mubr.bf16.mxu1 %v605_v21  ;;  %v3110_v21 = vmax.f32 %v2670_v8, 0.0 }
 0x1ad   :  { %v609_v5 = vpack.c.bf16 %v3110_v21, %v3111_v20  ;;  %v116_v21 = vld [vmem:[%s3037_s4] sm:$0x3]  ;;  %v3149_v20 = vsub.s32 0, %v2373_v3 }
 0x1af   :  { %v2783_v27 = vrot.slane %v116_v21, %v3149_v20 }
 0x1b2   :  { %976 = vmatmul.mubr.bf16.gmra.mrb[84].mxu1 %v604_v39  ;;  %v3118_v39 = vmax.f32 %v2647_v0, 0.0 }
 0x1b3   :  { %985 = vmatprep.mubr.bf16.mxu1 %v607_v7  ;;  %v3117_v7 = vmax.f32 %v2662_v29, 0.0 }
 0x1b5   :  { %v608_v56 = vpack.c.bf16 %v3117_v7, %v3118_v39 }
 0x1ba   :  { %986 = vmatmul.mubr.bf16.gmra.mrb[88].mxu1 %v606_v55 }
 0x1bb   :  { %995 = vmatprep.mubr.bf16.mxu1 %v609_v5  ;;  %v3150_v5 = vsub.s32 1, %v2373_v3  ;;  %v3151_v3 = vmax.f32 %v2397_v16, 0.0 }
 0x1bd   :  { %v2787_v55 = vrot.slane %v116_v21, %v3150_v5  ;;  %v3152_v5 = vmax.f32 %v2400_v17, 0.0 }
 0x1c2   :  { %996 = vmatmul.mubr.bf16.gmra.mrb[92].mxu1 %v608_v56 }
 0x21d   :  { %v847_v45 = vpop.f32.mrb[32].mxu1 }
 0x21e   :  { %v848_v6 = vadd.f32 %v847_v45, %v2783_v27  ;;  %v849_v58 = vpop.f32.mrb[33].mxu1  ;;  %v3153_v45 = vmax.f32 %v2394_v13, 0.0 }
 0x21f   :  { %v850_v12 = vadd.f32 %v849_v58, %v2787_v55  ;;  %v851_v7 = vpop.f32.mrb[34].mxu1  ;;  %v3154_v58 = vmax.f32 %v2408_v23, 0.0  ;;  %v3155_v23 = vmax.f32 %v2432_v43, 0.0 }
 0x220   :  { %v1006_v56 = vmax.f32 %v848_v6, 0.0  ;;  %v852_v39 = vadd.f32 %v851_v7, %v2783_v27  ;;  %v853_v8 = vpop.f32.mrb[35].mxu1 }
 0x221   :  { %v1007_v59 = vmax.f32 %v850_v12, 0.0  ;;  %v854_v29 = vadd.f32 %v853_v8, %v2787_v55 }
 0x222   :  { %v1008_v20 = vmax.f32 %v852_v39, 0.0  ;;  %v1070_v21 = vadd.f32 %v1006_v56, %v3151_v3 }
 0x223   :  { %v1009_v0 = vmax.f32 %v854_v29, 0.0  ;;  %v1071_v37 = vadd.f32 %v1007_v59, %v3153_v45 }
 0x224   :  { %v1072_v32 = vadd.f32 %v1008_v20, %v3152_v5 }
 0x225   :  { %v1073_v6 = vadd.f32 %v1009_v0, %v3154_v58  ;;  %v857_v26 = vpop.f32.mrb[36].mxu1 }
 0x226   :  { %v1134_v7 = vpack.c.bf16 %v1072_v32, %v1070_v21  ;;  %v858_v12 = vadd.f32 %v857_v26, %v2783_v27  ;;  %v859_v25 = vpop.f32.mrb[37].mxu1  ;;  %v3156_v26 = vmax.f32 %v2435_v44, 0.0  ;;  %v3158_v21 = vmax.f32 %v2441_v49, 0.0 }
 0x227   :  { %v860_v8 = vadd.f32 %v859_v25, %v2787_v55  ;;  %v861_v29 = vpop.f32.mrb[38].mxu1  ;;  %v1135_v39 = vpack.c.bf16 %v1073_v6, %v1071_v37  ;;  %v3157_v25 = vmax.f32 %v2426_v38, 0.0 }
 0x228   :  { %v1010_v16 = vmax.f32 %v858_v12, 0.0  ;;  %v862_v56 = vadd.f32 %v861_v29, %v2783_v27  ;;  %v863_v17 = vpop.f32.mrb[39].mxu1 }
 0x229   :  { %v1011_v20 = vmax.f32 %v860_v8, 0.0  ;;  %v864_v13 = vadd.f32 %v863_v17, %v2787_v55  ;;  %1332 = vmatprep.mubr.bf16.mxu0 %v1135_v39  ;;  %v3159_v17 = vmax.f32 %v2468_v10, 0.0 }
 0x22a   :  { %v1012_v59 = vmax.f32 %v862_v56, 0.0  ;;  %1333 = vmatmul.mubr.bf16.vlgmr.msra.gmra.mrb[32].mxu0 %v1134_v7  ;;  %v1074_v32 = vadd.f32 %v1010_v16, %v3155_v23 }
 0x22b   :  { %v1013_v0 = vmax.f32 %v864_v13, 0.0  ;;  %v1075_v37 = vadd.f32 %v1011_v20, %v3157_v25  ;;  %v3160_v13 = vmax.f32 %v2471_v14, 0.0 }
 0x22c   :  { %v1076_v3 = vadd.f32 %v1012_v59, %v3156_v26 }
 0x22d   :  { %v1077_v5 = vadd.f32 %v1013_v0, %v3158_v21  ;;  %v867_v45 = vpop.f32.mrb[40].mxu1  ;;  %v3161_v0 = vmax.f32 %v2462_v1, 0.0 }
 0x22e   :  { %v868_v58 = vadd.f32 %v867_v45, %v2783_v27  ;;  %v869_v6 = vpop.f32.mrb[41].mxu1  ;;  %v1136_v12 = vpack.c.bf16 %v1076_v3, %v1074_v32  ;;  %v3162_v32 = vmax.f32 %v2477_v24, 0.0 }
 0x22f   :  { %v870_v7 = vadd.f32 %v869_v6, %v2787_v55  ;;  %v871_v8 = vpop.f32.mrb[42].mxu1  ;;  %v1137_v29 = vpack.c.bf16 %v1077_v5, %v1075_v37 }
 0x230   :  { %v1014_v43 = vmax.f32 %v868_v58, 0.0  ;;  %v872_v39 = vadd.f32 %v871_v8, %v2783_v27  ;;  %v873_v44 = vpop.f32.mrb[43].mxu1  ;;  %v3163_v8 = vmax.f32 %v2504_v60, 0.0 }
 0x231   :  { %v1015_v16 = vmax.f32 %v870_v7, 0.0  ;;  %v874_v38 = vadd.f32 %v873_v44, %v2787_v55  ;;  %1340 = vmatprep.mubr.bf16.mxu0 %v1137_v29  ;;  %v3165_v44 = vmax.f32 %v2498_v54, 0.0 }
 0x232   :  { %v1016_v56 = vmax.f32 %v872_v39, 0.0  ;;  %1341 = vmatmul.mubr.bf16.gmra.mrb[36].mxu0 %v1136_v12  ;;  %v1078_v20 = vadd.f32 %v1014_v43, %v3159_v17  ;;  %v3164_v43 = vmax.f32 %v2507_v61, 0.0 }
 0x233   :  { %v1017_v49 = vmax.f32 %v874_v38, 0.0  ;;  %v1079_v23 = vadd.f32 %v1015_v16, %v3161_v0  ;;  %v3166_v38 = vmax.f32 %v2513_v9, 0.0 }
 0x234   :  { %v1080_v59 = vadd.f32 %v1016_v56, %v3160_v13 }
 0x235   :  { %v1081_v26 = vadd.f32 %v1017_v49, %v3162_v32  ;;  %v877_v3 = vpop.f32.mrb[44].mxu1 }
 0x236   :  { %v878_v25 = vadd.f32 %v877_v3, %v2783_v27  ;;  %v879_v37 = vpop.f32.mrb[45].mxu1  ;;  %v1138_v21 = vpack.c.bf16 %v1080_v59, %v1078_v20 }
 0x237   :  { %v880_v5 = vadd.f32 %v879_v37, %v2787_v55  ;;  %v881_v45 = vpop.f32.mrb[46].mxu1  ;;  %v1139_v58 = vpack.c.bf16 %v1081_v26, %v1079_v23 }
 0x238   :  { %v1018_v10 = vmax.f32 %v878_v25, 0.0  ;;  %v882_v6 = vadd.f32 %v881_v45, %v2783_v27  ;;  %v883_v14 = vpop.f32.mrb[47].mxu1  ;;  %v3167_v25 = vmax.f32 %v2540_v33, 0.0 }
 0x239   :  { %v1019_v12 = vmax.f32 %v880_v5, 0.0  ;;  %v884_v1 = vadd.f32 %v883_v14, %v2787_v55  ;;  %1348 = vmatprep.mubr.bf16.mxu0 %v1139_v58  ;;  %v3170_v58 = vld [vmem:[#allocation15_spill] sm:$0xff]  ;;  %v3172_v14 = vld [vmem:[#allocation17_spill] sm:$0xff] }
 0x23a   :  { %v1020_v7 = vmax.f32 %v882_v6, 0.0  ;;  %1349 = vmatmul.mubr.bf16.gmra.mrb[40].mxu0 %v1138_v21  ;;  %v1082_v29 = vadd.f32 %v1018_v10, %v3163_v8  ;;  %v3168_v21 = vld [vmem:[#allocation16_spill] sm:$0xff]  ;;  %v3171_v10 = vmax.f32 %v3170_v58, 0.0 }
 0x23b   :  { %v1021_v24 = vmax.f32 %v884_v1, 0.0  ;;  %v1083_v16 = vadd.f32 %v1019_v12, %v3165_v44  ;;  %v3169_v5 = vmax.f32 %v3168_v21, 0.0  ;;  %v3173_v12 = vmax.f32 %v3172_v14, 0.0 }
 0x23c   :  { %v1084_v39 = vadd.f32 %v1020_v7, %v3164_v43 }
 0x23d   :  { %v1085_v56 = vadd.f32 %v1021_v24, %v3166_v38  ;;  %v887_v49 = vpop.f32.mrb[48].mxu1 }
 0x23e   :  { %v888_v17 = vadd.f32 %v887_v49, %v2783_v27  ;;  %v889_v20 = vpop.f32.mrb[49].mxu1  ;;  %v1140_v13 = vpack.c.bf16 %v1084_v39, %v1082_v29 }
 0x23f   :  { %v890_v59 = vadd.f32 %v889_v20, %v2787_v55  ;;  %v891_v0 = vpop.f32.mrb[50].mxu1  ;;  %v1141_v23 = vpack.c.bf16 %v1085_v56, %v1083_v16 }
 0x240   :  { %v1022_v60 = vmax.f32 %v888_v17, 0.0  ;;  %v892_v32 = vadd.f32 %v891_v0, %v2783_v27  ;;  %v893_v61 = vpop.f32.mrb[51].mxu1 }
 0x241   :  { %v1023_v26 = vmax.f32 %v890_v59, 0.0  ;;  %v894_v54 = vadd.f32 %v893_v61, %v2787_v55  ;;  %1356 = vmatprep.mubr.bf16.mxu0 %v1141_v23  ;;  %v3176_v23 = vld [vmem:[#allocation20_spill] sm:$0xff]  ;;  %v3178_v61 = vld [vmem:[#allocation18_spill] sm:$0xff] }
 0x242   :  { %v1024_v3 = vmax.f32 %v892_v32, 0.0  ;;  %1357 = vmatmul.mubr.bf16.gmra.mrb[44].mxu0 %v1140_v13  ;;  %v1086_v37 = vadd.f32 %v1022_v60, %v3167_v25  ;;  %v3174_v13 = vld [vmem:[#allocation19_spill] sm:$0xff]  ;;  %v3177_v60 = vmax.f32 %v3176_v23, 0.0 }
 0x243   :  { %v1025_v9 = vmax.f32 %v894_v54, 0.0  ;;  %v1087_v6 = vadd.f32 %v1023_v26, %v3171_v10  ;;  %v3175_v59 = vmax.f32 %v3174_v13, 0.0  ;;  %v3179_v26 = vmax.f32 %v3178_v61, 0.0 }
 0x244   :  { %v1088_v45 = vadd.f32 %v1024_v3, %v3169_v5  ;;  %v3180_v3 = vld [vmem:[#allocation21_spill] sm:$0xff] }
 0x245   :  { %v1089_v1 = vadd.f32 %v1025_v9, %v3173_v12  ;;  %v897_v7 = vpop.f32.mrb[52].mxu1  ;;  %v3181_v9 = vmax.f32 %v3180_v3, 0.0 }
 0x246   :  { %v898_v24 = vadd.f32 %v897_v7, %v2783_v27  ;;  %v899_v8 = vpop.f32.mrb[53].mxu1  ;;  %v1142_v29 = vpack.c.bf16 %v1088_v45, %v1086_v37 }
 0x247   :  { %v900_v43 = vadd.f32 %v899_v8, %v2787_v55  ;;  %v901_v39 = vpop.f32.mrb[54].mxu1  ;;  %v1143_v44 = vpack.c.bf16 %v1089_v1, %v1087_v6 }
 0x248   :  { %v1026_v33 = vmax.f32 %v898_v24, 0.0  ;;  %v902_v16 = vadd.f32 %v901_v39, %v2783_v27  ;;  %v903_v38 = vpop.f32.mrb[55].mxu1 }
 0x249   :  { %v1027_v56 = vmax.f32 %v900_v43, 0.0  ;;  %v904_v49 = vadd.f32 %v903_v38, %v2787_v55  ;;  %1364 = vmatprep.mubr.bf16.mxu0 %v1143_v44  ;;  %v3182_v43 = vld [vmem:[#allocation25_spill] sm:$0xff] }
 0x24a   :  { %v1028_v17 = vmax.f32 %v902_v16, 0.0  ;;  %1365 = vmatmul.mubr.bf16.gmra.mrb[48].mxu0 %v1142_v29  ;;  %v1090_v0 = vadd.f32 %v1026_v33, %v3175_v59  ;;  %v3183_v39 = vmax.f32 %v3182_v43, 0.0  ;;  %v3184_v33 = vld [vmem:[#allocation26_spill] sm:$0xff] }
 0x24b   :  { %v1029_v20 = vmax.f32 %v904_v49, 0.0  ;;  %v1091_v54 = vadd.f32 %v1027_v56, %v3179_v26  ;;  %v3185_v16 = vmax.f32 %v3184_v33, 0.0  ;;  %v3186_v56 = vld [vmem:[#allocation23_spill] sm:$0xff] }
 0x24c   :  { %v1092_v32 = vadd.f32 %v1028_v17, %v3177_v60  ;;  %v3187_v49 = vmax.f32 %v3186_v56, 0.0 }
 0x24d   :  { %v1093_v25 = vadd.f32 %v1029_v20, %v3181_v9  ;;  %v907_v37 = vpop.f32.mrb[56].mxu1  ;;  %v3188_v20 = vld [vmem:[#allocation28_spill] sm:$0xff] }
 0x24e   :  { %v908_v21 = vadd.f32 %v907_v37, %v2783_v27  ;;  %v909_v5 = vpop.f32.mrb[57].mxu1  ;;  %v1144_v45 = vpack.c.bf16 %v1092_v32, %v1090_v0  ;;  %v3189_v13 = vmax.f32 %v3188_v20, 0.0 }
 0x24f   :  { %v910_v58 = vadd.f32 %v909_v5, %v2787_v55  ;;  %v911_v10 = vpop.f32.mrb[58].mxu1  ;;  %v1145_v6 = vpack.c.bf16 %v1093_v25, %v1091_v54 }
 0x250   :  { %v1030_v14 = vmax.f32 %v908_v21, 0.0  ;;  %v912_v12 = vadd.f32 %v911_v10, %v2783_v27  ;;  %v913_v1 = vpop.f32.mrb[59].mxu1 }
 0x251   :  { %v1031_v7 = vmax.f32 %v910_v58, 0.0  ;;  %v914_v24 = vadd.f32 %v913_v1, %v2787_v55  ;;  %1372 = vmatprep.mubr.bf16.mxu0 %v1145_v6  ;;  %v3190_v58 = vmax.f32 %v2656_v22, 0.0  ;;  %v3191_v6 = vmax.f32 %v2659_v53, 0.0 }
 0x252   :  { %v1032_v8 = vmax.f32 %v912_v12, 0.0  ;;  %1373 = vmatmul.mubr.bf16.gmra.mrb[52].mxu0 %v1144_v45  ;;  %v1094_v44 = vadd.f32 %v1030_v14, %v3183_v39  ;;  %v3192_v12 = vld [vmem:[#allocation31_spill] sm:$0xff] }
 0x253   :  { %v1033_v29 = vmax.f32 %v914_v24, 0.0  ;;  %v1095_v17 = vadd.f32 %v1031_v7, %v3187_v49  ;;  %v3193_v1 = vmax.f32 %v3192_v12, 0.0  ;;  %v3194_v24 = vld [vmem:[#allocation34_spill] sm:$0xff]  ;;  %v3200_v12 = vmax.f32 %v2423_v36, 0.0 }
 0x254   :  { %v1096_v38 = vadd.f32 %v1032_v8, %v3185_v16  ;;  %v3195_v8 = vmax.f32 %v3194_v24, 0.0 }
 0x255   :  { %v1097_v59 = vadd.f32 %v1033_v29, %v3189_v13  ;;  %v917_v0 = vpop.f32.mrb[60].mxu1 }
 0x256   :  { %v918_v23 = vadd.f32 %v917_v0, %v2783_v27  ;;  %v919_v60 = vpop.f32.mrb[61].mxu1  ;;  %v1146_v32 = vpack.c.bf16 %v1096_v38, %v1094_v44  ;;  %v3196_v0 = vmax.f32 %v2389_v11, 0.0 }
 0x257   :  { %v920_v61 = vadd.f32 %v919_v60, %v2787_v55  ;;  %v921_v26 = vpop.f32.mrb[62].mxu1  ;;  %v1147_v54 = vpack.c.bf16 %v1097_v59, %v1095_v17  ;;  %v3197_v60 = vmax.f32 %v2403_v19, 0.0 }
 0x258   :  { %v1034_v3 = vmax.f32 %v918_v23, 0.0  ;;  %v922_v9 = vadd.f32 %v921_v26, %v2783_v27  ;;  %v923_v25 = vpop.f32.mrb[63].mxu1 }
 0x259   :  { %v1035_v37 = vmax.f32 %v920_v61, 0.0  ;;  %v924_v21 = vadd.f32 %v923_v25, %v2787_v55  ;;  %1380 = vmatprep.mubr.bf16.mxu0 %v1147_v54  ;;  %v3198_v61 = vmax.f32 %v2636_v34, 0.0  ;;  %v3199_v54 = vmax.f32 %v2640_v52, 0.0 }
 0x25a   :  { %v1036_v5 = vmax.f32 %v922_v9, 0.0  ;;  %1381 = vmatmul.mubr.bf16.gmra.mrb[56].mxu0 %v1146_v32  ;;  %v1098_v10 = vadd.f32 %v1034_v3, %v3190_v58 }
 0x25b   :  { %v1037_v45 = vmax.f32 %v924_v21, 0.0  ;;  %v1099_v7 = vadd.f32 %v1035_v37, %v3193_v1 }
 0x25c   :  { %v1100_v14 = vadd.f32 %v1036_v5, %v3191_v6 }
 0x25d   :  { %v1101_v29 = vadd.f32 %v1037_v45, %v3195_v8  ;;  %v927_v43 = vpop.f32.mrb[64].mxu1  ;;  %v3202_v8 = vmax.f32 %v2429_v40, 0.0 }
 0x25e   :  { %v928_v39 = vadd.f32 %v927_v43, %v2783_v27  ;;  %v929_v44 = vpop.f32.mrb[65].mxu1  ;;  %v1148_v33 = vpack.c.bf16 %v1100_v14, %v1098_v10  ;;  %v3203_v43 = vmax.f32 %v2444_v50, 0.0 }
 0x25f   :  { %v930_v16 = vadd.f32 %v929_v44, %v2787_v55  ;;  %v931_v38 = vpop.f32.mrb[66].mxu1  ;;  %v1149_v56 = vpack.c.bf16 %v1101_v29, %v1099_v7  ;;  %v3201_v7 = vmax.f32 %v2438_v46, 0.0 }
 0x260   :  { %v1038_v22 = vmax.f32 %v928_v39, 0.0  ;;  %v932_v49 = vadd.f32 %v931_v38, %v2783_v27  ;;  %v933_v53 = vpop.f32.mrb[67].mxu1 }
 0x261   :  { %v1039_v17 = vmax.f32 %v930_v16, 0.0  ;;  %v934_v20 = vadd.f32 %v933_v53, %v2787_v55  ;;  %1388 = vmatprep.mubr.bf16.mxu0 %v1149_v56 }
 0x262   :  { %v1040_v13 = vmax.f32 %v932_v49, 0.0  ;;  %1389 = vmatmul.mubr.bf16.gmra.mrb[60].mxu0 %v1148_v33  ;;  %v1102_v23 = vadd.f32 %v1038_v22, %v3196_v0  ;;  %v3205_v0 = vmax.f32 %v2474_v18, 0.0 }
 0x263   :  { %v1041_v59 = vmax.f32 %v934_v20, 0.0  ;;  %v1103_v26 = vadd.f32 %v1039_v17, %v3198_v61  ;;  %v3207_v61 = vmax.f32 %v2480_v28, 0.0 }
 0x264   :  { %v1104_v32 = vadd.f32 %v1040_v13, %v3197_v60  ;;  %v3204_v13 = vmax.f32 %v2459_v62, 0.0  ;;  %v3206_v60 = vmax.f32 %v2465_v4, 0.0 }
 0x265   :  { %v1105_v3 = vadd.f32 %v1041_v59, %v3199_v54  ;;  %v937_v9 = vpop.f32.mrb[68].mxu1 }
 0x266   :  { %v938_v25 = vadd.f32 %v937_v9, %v2783_v27  ;;  %v939_v37 = vpop.f32.mrb[69].mxu1  ;;  %v1150_v21 = vpack.c.bf16 %v1104_v32, %v1102_v23 }
 0x267   :  { %v940_v5 = vadd.f32 %v939_v37, %v2787_v55  ;;  %v941_v45 = vpop.f32.mrb[70].mxu1  ;;  %v1151_v58 = vpack.c.bf16 %v1105_v3, %v1103_v26 }
 0x268   :  { %v1042_v11 = vmax.f32 %v938_v25, 0.0  ;;  %v942_v10 = vadd.f32 %v941_v45, %v2783_v27  ;;  %v943_v19 = vpop.f32.mrb[71].mxu1 }
 0x269   :  { %v1043_v6 = vmax.f32 %v940_v5, 0.0  ;;  %v944_v34 = vadd.f32 %v943_v19, %v2787_v55  ;;  %1396 = vmatprep.mubr.bf16.mxu0 %v1151_v58 }
 0x26a   :  { %v1044_v14 = vmax.f32 %v942_v10, 0.0  ;;  %1397 = vmatmul.mubr.bf16.gmra.mrb[64].mxu0 %v1150_v21  ;;  %v1106_v1 = vadd.f32 %v1042_v11, %v3200_v12  ;;  %v3208_v10 = vmax.f32 %v2495_v47, 0.0  ;;  %v3211_v12 = vmax.f32 %v2516_v15, 0.0 }
 0x26b   :  { %v1045_v52 = vmax.f32 %v944_v34, 0.0  ;;  %v1107_v29 = vadd.f32 %v1043_v6, %v3202_v8  ;;  %v3209_v6 = vmax.f32 %v2510_v2, 0.0 }
 0x26c   :  { %v1108_v24 = vadd.f32 %v1044_v14, %v3201_v7  ;;  %v3210_v14 = vmax.f32 %v2501_v57, 0.0 }
 0x26d   :  { %v1109_v39 = vadd.f32 %v1045_v52, %v3203_v43  ;;  %v947_v44 = vpop.f32.mrb[72].mxu1 }
 0x26e   :  { %v948_v33 = vadd.f32 %v947_v44, %v2783_v27  ;;  %v949_v16 = vpop.f32.mrb[73].mxu1  ;;  %v1152_v38 = vpack.c.bf16 %v1108_v24, %v1106_v1 }
 0x26f   :  { %v950_v56 = vadd.f32 %v949_v16, %v2787_v55  ;;  %v951_v22 = vpop.f32.mrb[74].mxu1  ;;  %v1153_v49 = vpack.c.bf16 %v1109_v39, %v1107_v29 }
 0x270   :  { %v1046_v36 = vmax.f32 %v948_v33, 0.0  ;;  %v952_v53 = vadd.f32 %v951_v22, %v2783_v27  ;;  %v953_v46 = vpop.f32.mrb[75].mxu1 }
 0x271   :  { %v1047_v17 = vmax.f32 %v950_v56, 0.0  ;;  %v954_v40 = vadd.f32 %v953_v46, %v2787_v55  ;;  %1404 = vmatprep.mubr.bf16.mxu0 %v1153_v49  ;;  %v3212_v56 = vmax.f32 %v2531_v48, 0.0  ;;  %v3213_v49 = vmax.f32 %v2546_v41, 0.0 }
 0x272   :  { %v1048_v20 = vmax.f32 %v952_v53, 0.0  ;;  %1405 = vmatmul.mubr.bf16.gmra.mrb[68].mxu0 %v1152_v38  ;;  %v1110_v59 = vadd.f32 %v1046_v36, %v3204_v13  ;;  %v3214_v53 = vmax.f32 %v2537_v63, 0.0 }
 0x273   :  { %v1049_v50 = vmax.f32 %v954_v40, 0.0  ;;  %v1111_v32 = vadd.f32 %v1047_v17, %v3206_v60  ;;  %v3215_v17 = vmax.f32 %v2552_v35, 0.0 }
 0x274   :  { %v1112_v23 = vadd.f32 %v1048_v20, %v3205_v0 }
 0x275   :  { %v1113_v26 = vadd.f32 %v1049_v50, %v3207_v61  ;;  %v957_v54 = vpop.f32.mrb[76].mxu1 }
 0x276   :  { %v958_v3 = vadd.f32 %v957_v54, %v2783_v27  ;;  %v959_v9 = vpop.f32.mrb[77].mxu1  ;;  %v1154_v25 = vpack.c.bf16 %v1112_v23, %v1110_v59  ;;  %v3216_v54 = vmax.f32 %v2567_v30, 0.0 }
 0x277   :  { %v960_v37 = vadd.f32 %v959_v9, %v2787_v55  ;;  %v961_v21 = vpop.f32.mrb[78].mxu1  ;;  %v1155_v5 = vpack.c.bf16 %v1113_v26, %v1111_v32  ;;  %v3217_v9 = vmax.f32 %v2582_v31, 0.0 }
 0x278   :  { %v1050_v62 = vmax.f32 %v958_v3, 0.0  ;;  %v962_v45 = vadd.f32 %v961_v21, %v2783_v27  ;;  %v963_v18 = vpop.f32.mrb[79].mxu1 }
 0x279   :  { %v1051_v58 = vmax.f32 %v960_v37, 0.0  ;;  %v964_v4 = vadd.f32 %v963_v18, %v2787_v55  ;;  %1412 = vmatprep.mubr.bf16.mxu0 %v1155_v5  ;;  %v3218_v37 = vmax.f32 %v2573_v51, 0.0  ;;  %v3219_v5 = vmax.f32 %v2588_v42, 0.0 }
 0x27a   :  { %v1052_v11 = vmax.f32 %v962_v45, 0.0  ;;  %1413 = vmatmul.mubr.bf16.gmra.mrb[72].mxu0 %v1154_v25  ;;  %v1114_v19 = vadd.f32 %v1050_v62, %v3208_v10 }
 0x27b   :  { %v1053_v28 = vmax.f32 %v964_v4, 0.0  ;;  %v1115_v52 = vadd.f32 %v1051_v58, %v3210_v14  ;;  %v3220_v14 = vld [vmem:[#allocation22_spill] sm:$0xff] }
 0x27c   :  { %v1116_v34 = vadd.f32 %v1052_v11, %v3209_v6 }
 0x27d   :  { %v1117_v1 = vadd.f32 %v1053_v28, %v3211_v12  ;;  %v967_v7 = vpop.f32.mrb[80].mxu1 }
 0x27e   :  { %v968_v24 = vadd.f32 %v967_v7, %v2783_v27  ;;  %v969_v8 = vpop.f32.mrb[81].mxu1  ;;  %v1156_v29 = vpack.c.bf16 %v1116_v34, %v1114_v19 }
 0x27f   :  { %v970_v43 = vadd.f32 %v969_v8, %v2787_v55  ;;  %v971_v39 = vpop.f32.mrb[82].mxu1  ;;  %v1157_v44 = vpack.c.bf16 %v1117_v1, %v1115_v52  ;;  %v3221_v52 = vmax.f32 %v3220_v14, 0.0  ;;  %v3222_v1 = vld [vmem:[#allocation27_spill] sm:$0xff]  ;;  %v3224_v8 = vld [vmem:[#allocation24_spill] sm:$0xff] }
 0x280   :  { %v1054_v47 = vmax.f32 %v968_v24, 0.0  ;;  %v972_v33 = vadd.f32 %v971_v39, %v2783_v27  ;;  %v973_v2 = vpop.f32.mrb[83].mxu1  ;;  %v3223_v7 = vmax.f32 %v3222_v1, 0.0  ;;  %v3226_v39 = vld [vmem:[#allocation29_spill] sm:$0xff] }
 0x281   :  { %v1055_v16 = vmax.f32 %v970_v43, 0.0  ;;  %v974_v57 = vadd.f32 %v973_v2, %v2787_v55  ;;  %1420 = vmatprep.mubr.bf16.mxu0 %v1157_v44  ;;  %v3227_v44 = vmax.f32 %v3226_v39, 0.0 }
 0x282   :  { %v1056_v38 = vmax.f32 %v972_v33, 0.0  ;;  %1421 = vmatmul.mubr.bf16.gmra.mrb[76].mxu0 %v1156_v29  ;;  %v1118_v22 = vadd.f32 %v1054_v47, %v3212_v56  ;;  %v3225_v29 = vmax.f32 %v3224_v8, 0.0 }
 0x283   :  { %v1057_v15 = vmax.f32 %v974_v57, 0.0  ;;  %v1119_v46 = vadd.f32 %v1055_v16, %v3214_v53 }
 0x284   :  { %v1120_v36 = vadd.f32 %v1056_v38, %v3213_v49 }
 0x285   :  { %v1121_v40 = vadd.f32 %v1057_v15, %v3215_v17  ;;  %v977_v20 = vpop.f32.mrb[84].mxu1 }
 0x286   :  { %v978_v50 = vadd.f32 %v977_v20, %v2783_v27  ;;  %v979_v13 = vpop.f32.mrb[85].mxu1  ;;  %v1158_v59 = vpack.c.bf16 %v1120_v36, %v1118_v22  ;;  %v3228_v20 = vld [vmem:[#allocation30_spill] sm:$0xff] }
 0x287   :  { %v980_v0 = vadd.f32 %v979_v13, %v2787_v55  ;;  %v981_v23 = vpop.f32.mrb[86].mxu1  ;;  %v1159_v60 = vpack.c.bf16 %v1121_v40, %v1119_v46 }
 0x288   :  { %v1058_v48 = vmax.f32 %v978_v50, 0.0  ;;  %v982_v32 = vadd.f32 %v981_v23, %v2783_v27  ;;  %v983_v41 = vpop.f32.mrb[87].mxu1  ;;  %v3229_v50 = vmax.f32 %v3228_v20, 0.0 }
 0x289   :  { %v1059_v61 = vmax.f32 %v980_v0, 0.0  ;;  %v984_v63 = vadd.f32 %v983_v41, %v2787_v55  ;;  %1428 = vmatprep.mubr.bf16.mxu0 %v1159_v60  ;;  %v3232_v60 = vld [vmem:[#allocation32_spill] sm:$0xff]  ;;  %v3234_v41 = vld [vmem:[#allocation35_spill] sm:$0xff] }
 0x28a   :  { %v1060_v26 = vmax.f32 %v982_v32, 0.0  ;;  %1429 = vmatmul.mubr.bf16.gmra.mrb[80].mxu0 %v1158_v59  ;;  %v1122_v3 = vadd.f32 %v1058_v48, %v3216_v54  ;;  %v3230_v59 = vld [vmem:[#allocation33_spill] sm:$0xff]  ;;  %v3233_v48 = vmax.f32 %v3232_v60, 0.0 }
 0x28b   :  { %v1061_v35 = vmax.f32 %v984_v63, 0.0  ;;  %v1123_v21 = vadd.f32 %v1059_v61, %v3218_v37  ;;  %v3231_v0 = vmax.f32 %v3230_v59, 0.0  ;;  %v3235_v61 = vmax.f32 %v3234_v41, 0.0 }
 0x28c   :  { %v1124_v25 = vadd.f32 %v1060_v26, %v3217_v9  ;;  %v2984_v9 = vld [vmem:[%s3039_s6] ss:$0 sm:$0xff]  ;;  %s2249_s6 = smov [#allocation10]  }
 0x28d   :  { %v1125_v62 = vadd.f32 %v1061_v35, %v3219_v5  ;;  %v987_v45 = vpop.f32.mrb[88].mxu1  ;;  %s1626_s8 = sshll.u32 %s2249_s6, 4  ;;  %s1627_s8 = int_to_ptr.vmem [resolvable:$true] %s1626_s8 }
 0x28e   :  { %v988_v18 = vadd.f32 %v987_v45, %v2783_v27  ;;  %v989_v58 = vpop.f32.mrb[89].mxu1  ;;  %v1160_v4 = vpack.c.bf16 %v1124_v25, %v1122_v3  ;;  %s2210_s9 = scalar_lea.vmem %s1627_s8, 2048  ;;  %p2215_p5 = scmp.lt.s32.totalorder %s1627_s8, %s1627_s8 }
 0x28f   :  { %v990_v11 = vadd.f32 %v989_v58, %v2787_v55  ;;  %v991_v28 = vpop.f32.mrb[90].mxu1  ;;  %v1161_v10 = vpack.c.bf16 %v1125_v62, %v1123_v21  ;;  %p2211_p4 = scmp.ne.s32.totalorder %s1627_s8, %s2210_s9  ;;  %p2216_p6 = scmp.lt.s32.totalorder %s2210_s9, %s2210_s9 }
 0x290   :  { %v1062_v30 = vmax.f32 %v988_v18, 0.0  ;;  %v992_v19 = vadd.f32 %v991_v28, %v2783_v27  ;;  %v993_v31 = vpop.f32.mrb[91].mxu1 }
 0x291   :  { %v1063_v6 = vmax.f32 %v990_v11, 0.0  ;;  %v994_v51 = vadd.f32 %v993_v31, %v2787_v55  ;;  %1436 = vmatprep.mubr.bf16.mxu0 %v1161_v10  ;;  %p2217_p7 = por %p2216_p6, %p2215_p5 }
 0x292   :  { %v1064_v34 = vmax.f32 %v992_v19, 0.0  ;;  %1437 = vmatmul.mubr.bf16.gmra.mrb[84].mxu0 %v1160_v4  ;;  %v1126_v12 = vadd.f32 %v1062_v30, %v3221_v52 }
 0x293   :  { %v1065_v42 = vmax.f32 %v994_v51, 0.0  ;;  %v1127_v43 = vadd.f32 %v1063_v6, %v3225_v29  ;;  %p2218_p8 = pnand %p2217_p7, %p2211_p4 }
 0x294   :  { %v1128_v24 = vadd.f32 %v1064_v34, %v3223_v7 }
 0x295   :  { %v1129_v47 = vadd.f32 %v1065_v42, %v3227_v44  ;;  %v997_v33 = vpop.f32.mrb[92].mxu1 }
 0x296   :  { %v998_v2 = vadd.f32 %v997_v33, %v2783_v27  ;;  %v999_v16 = vpop.f32.mrb[93].mxu1  ;;  %v1162_v57 = vpack.c.bf16 %v1128_v24, %v1126_v12 }
 0x297   :  { %v1000_v38 = vadd.f32 %v999_v16, %v2787_v55  ;;  %v1001_v15 = vpop.f32.mrb[94].mxu1  ;;  %v1163_v56 = vpack.c.bf16 %v1129_v47, %v1127_v43 }
 0x298   :  { %v1066_v22 = vmax.f32 %v998_v2, 0.0  ;;  %v1002_v49 = vadd.f32 %v1001_v15, %v2783_v27  ;;  %v1003_v36 = vpop.f32.mrb[95].mxu1 }
 0x299   :  { %v1067_v53 = vmax.f32 %v1000_v38, 0.0  ;;  %v1004_v46 = vadd.f32 %v1003_v36, %v2787_v55  ;;  %1444 = vmatprep.mubr.bf16.mxu0 %v1163_v56 }
 0x29a   :  { %v1068_v17 = vmax.f32 %v1002_v49, 0.0  ;;  %1445 = vmatmul.mubr.bf16.gmra.mrb[88].mxu0 %v1162_v57  ;;  %v1130_v13 = vadd.f32 %v1066_v22, %v3229_v50 }
 0x29b   :  { %v1069_v40 = vmax.f32 %v1004_v46, 0.0  ;;  %v1131_v32 = vadd.f32 %v1067_v53, %v3233_v48 }
 0x29c   :  { %v1132_v23 = vadd.f32 %v1068_v17, %v3231_v0 }
 0x29d   :  { %v1133_v27 = vadd.f32 %v1069_v40, %v3235_v61 }
 0x29e   :  { %v1164_v63 = vpack.c.bf16 %v1132_v23, %v1130_v13 }
 0x29f   :  { %v1165_v26 = vpack.c.bf16 %v1133_v27, %v1131_v32 }
 0x2a1   :  { %1452 = vmatprep.mubr.bf16.mxu0 %v1165_v26 }
 0x2a2   :  { %1453 = vmatmul.mubr.bf16.gmra.mrb[92].mxu0 %v1164_v63 }
 0x2fd   :  { %v1896_v55 = vpop.f32.mrb[32].mxu0 }
 0x2fe   :  { %v1897_v35 = vpop.f32.mrb[33].mxu0 }
 0x2ff   :  { %v1898_v54 = vadd.f32 %v1897_v35, %v1896_v55  ;;  %v1899_v3 = vpop.f32.mrb[34].mxu0 }
 0x300   :  { %v1900_v25 = vpop.f32.mrb[35].mxu0 }
 0x301   :  { %v1901_v37 = vadd.f32 %v1900_v25, %v1899_v3  ;;  %v1335_v21 = vadd.f32 %v1898_v54, %v2984_v9 }
 0x303   :  { %v1338_v5 = vadd.f32 %v1901_v37, %v2984_v9 }
 0x305   :  { %v1788_v62 = vpack.c.bf16 %v1338_v5, %v1335_v21  ;;  %v1902_v45 = vpop.f32.mrb[36].mxu0 }
 0x306   :  { %v1903_v18 = vpop.f32.mrb[37].mxu0 }
 0x307   :  { %1789 = vst [vmem:[#allocation10] sm:$0xff] %v1788_v62   ;;  %v1904_v58 = vadd.f32 %v1903_v18, %v1902_v45  ;;  %v1905_v4 = vpop.f32.mrb[38].mxu0 }
 0x308   :  { %v1906_v11 = vpop.f32.mrb[39].mxu0 }
 0x309   :  { %v1907_v28 = vadd.f32 %v1906_v11, %v1905_v4  ;;  %v1343_v10 = vadd.f32 %v1904_v58, %v2984_v9 }
 0x30b   :  { %v1346_v30 = vadd.f32 %v1907_v28, %v2984_v9 }
 0x30d   :  { %v1793_v19 = vpack.c.bf16 %v1346_v30, %v1343_v10  ;;  %v1908_v31 = vpop.f32.mrb[40].mxu0 }
 0x30e   :  { %v1909_v6 = vpop.f32.mrb[41].mxu0 }
 0x30f   :  { %1865 = vst [vmem:[#allocation10 + $0x8] sm:$0xff] %v1793_v19   ;;  %v1910_v51 = vadd.f32 %v1909_v6, %v1908_v31  ;;  %v1911_v34 = vpop.f32.mrb[42].mxu0 }
 0x310   :  { %v1912_v42 = vpop.f32.mrb[43].mxu0 }
 0x311   :  { %v1913_v14 = vadd.f32 %v1912_v42, %v1911_v34  ;;  %v1351_v52 = vadd.f32 %v1910_v51, %v2984_v9 }
 0x313   :  { %v1354_v12 = vadd.f32 %v1913_v14, %v2984_v9 }
 0x315   :  { %v1798_v1 = vpack.c.bf16 %v1354_v12, %v1351_v52  ;;  %v1914_v7 = vpop.f32.mrb[44].mxu0 }
 0x316   :  { %v1915_v24 = vpop.f32.mrb[45].mxu0 }
 0x317   :  { %1866 = vst [vmem:[#allocation10 + $0x10] sm:$0xff] %v1798_v1   ;;  %v1916_v8 = vadd.f32 %v1915_v24, %v1914_v7  ;;  %v1917_v29 = vpop.f32.mrb[46].mxu0 }
 0x318   :  { %v1918_v43 = vpop.f32.mrb[47].mxu0 }
 0x319   :  { %v1919_v39 = vadd.f32 %v1918_v43, %v1917_v29  ;;  %v1359_v44 = vadd.f32 %v1916_v8, %v2984_v9 }
 0x31b   :  { %v1362_v47 = vadd.f32 %v1919_v39, %v2984_v9 }
 0x31d   :  { %v1803_v33 = vpack.c.bf16 %v1362_v47, %v1359_v44  ;;  %v1920_v2 = vpop.f32.mrb[48].mxu0 }
 0x31e   :  { %v1921_v16 = vpop.f32.mrb[49].mxu0 }
 0x31f   :  { %1867 = vst [vmem:[#allocation10 + $0x18] sm:$0xff] %v1803_v33   ;;  %v1922_v57 = vadd.f32 %v1921_v16, %v1920_v2  ;;  %v1923_v38 = vpop.f32.mrb[50].mxu0 }
 0x320   :  { %v1924_v15 = vpop.f32.mrb[51].mxu0 }
 0x321   :  { %v1925_v56 = vadd.f32 %v1924_v15, %v1923_v38  ;;  %v1367_v22 = vadd.f32 %v1922_v57, %v2984_v9 }
 0x323   :  { %v1370_v49 = vadd.f32 %v1925_v56, %v2984_v9 }
 0x325   :  { %v1808_v36 = vpack.c.bf16 %v1370_v49, %v1367_v22  ;;  %v1926_v53 = vpop.f32.mrb[52].mxu0 }
 0x326   :  { %v1927_v46 = vpop.f32.mrb[53].mxu0 }
 0x327   :  { %1868 = vst [vmem:[#allocation10 + $0x20] sm:$0xff] %v1808_v36   ;;  %v1928_v17 = vadd.f32 %v1927_v46, %v1926_v53  ;;  %v1929_v40 = vpop.f32.mrb[54].mxu0 }
 0x328   :  { %v1930_v20 = vpop.f32.mrb[55].mxu0 }
 0x329   :  { %v1931_v50 = vadd.f32 %v1930_v20, %v1929_v40  ;;  %v1375_v13 = vadd.f32 %v1928_v17, %v2984_v9 }
 0x32b   :  { %v1378_v59 = vadd.f32 %v1931_v50, %v2984_v9 }
 0x32d   :  { %v1813_v0 = vpack.c.bf16 %v1378_v59, %v1375_v13  ;;  %v1932_v23 = vpop.f32.mrb[56].mxu0 }
 0x32e   :  { %v1933_v60 = vpop.f32.mrb[57].mxu0 }
 0x32f   :  { %1869 = vst [vmem:[#allocation10 + $0x28] sm:$0xff] %v1813_v0   ;;  %v1934_v48 = vadd.f32 %v1933_v60, %v1932_v23  ;;  %v1935_v32 = vpop.f32.mrb[58].mxu0 }
 0x330   :  { %v1936_v41 = vpop.f32.mrb[59].mxu0 }
 0x331   :  { %v1937_v61 = vadd.f32 %v1936_v41, %v1935_v32  ;;  %v1383_v27 = vadd.f32 %v1934_v48, %v2984_v9 }
 0x333   :  { %v1386_v63 = vadd.f32 %v1937_v61, %v2984_v9 }
 0x335   :  { %v1818_v26 = vpack.c.bf16 %v1386_v63, %v1383_v27  ;;  %v1938_v55 = vpop.f32.mrb[60].mxu0 }
 0x336   :  { %v1939_v35 = vpop.f32.mrb[61].mxu0 }
 0x337   :  { %1870 = vst [vmem:[#allocation10 + $0x30] sm:$0xff] %v1818_v26   ;;  %v1940_v54 = vadd.f32 %v1939_v35, %v1938_v55  ;;  %v1941_v3 = vpop.f32.mrb[62].mxu0 }
 0x338   :  { %v1942_v25 = vpop.f32.mrb[63].mxu0 }
 0x339   :  { %v1943_v37 = vadd.f32 %v1942_v25, %v1941_v3  ;;  %v1391_v21 = vadd.f32 %v1940_v54, %v2984_v9 }
 0x33b   :  { %v1394_v5 = vadd.f32 %v1943_v37, %v2984_v9 }
 0x33d   :  { %v1823_v62 = vpack.c.bf16 %v1394_v5, %v1391_v21  ;;  %v1944_v45 = vpop.f32.mrb[64].mxu0 }
 0x33e   :  { %v1945_v18 = vpop.f32.mrb[65].mxu0 }
 0x33f   :  { %1871 = vst [vmem:[#allocation10 + $0x38] sm:$0xff] %v1823_v62   ;;  %v1946_v58 = vadd.f32 %v1945_v18, %v1944_v45  ;;  %v1947_v4 = vpop.f32.mrb[66].mxu0 }
 0x340   :  { %v1948_v11 = vpop.f32.mrb[67].mxu0 }
 0x341   :  { %v1949_v28 = vadd.f32 %v1948_v11, %v1947_v4  ;;  %v1399_v10 = vadd.f32 %v1946_v58, %v2984_v9 }
 0x343   :  { %v1402_v30 = vadd.f32 %v1949_v28, %v2984_v9 }
 0x345   :  { %v1828_v19 = vpack.c.bf16 %v1402_v30, %v1399_v10  ;;  %v1950_v31 = vpop.f32.mrb[68].mxu0 }
 0x346   :  { %v1951_v6 = vpop.f32.mrb[69].mxu0 }
 0x347   :  { %1872 = vst [vmem:[#allocation10 + $0x40] sm:$0xff] %v1828_v19   ;;  %v1952_v51 = vadd.f32 %v1951_v6, %v1950_v31  ;;  %v1953_v34 = vpop.f32.mrb[70].mxu0 }
 0x348   :  { %v1954_v42 = vpop.f32.mrb[71].mxu0 }
 0x349   :  { %v1955_v14 = vadd.f32 %v1954_v42, %v1953_v34  ;;  %v1407_v52 = vadd.f32 %v1952_v51, %v2984_v9 }
 0x34b   :  { %v1410_v12 = vadd.f32 %v1955_v14, %v2984_v9 }
 0x34d   :  { %v1833_v1 = vpack.c.bf16 %v1410_v12, %v1407_v52  ;;  %v1956_v7 = vpop.f32.mrb[72].mxu0 }
 0x34e   :  { %v1957_v24 = vpop.f32.mrb[73].mxu0 }
 0x34f   :  { %1873 = vst [vmem:[#allocation10 + $0x48] sm:$0xff] %v1833_v1   ;;  %v1958_v8 = vadd.f32 %v1957_v24, %v1956_v7  ;;  %v1959_v29 = vpop.f32.mrb[74].mxu0 }
 0x350   :  { %v1960_v43 = vpop.f32.mrb[75].mxu0 }
 0x351   :  { %v1961_v39 = vadd.f32 %v1960_v43, %v1959_v29  ;;  %v1415_v44 = vadd.f32 %v1958_v8, %v2984_v9 }
 0x353   :  { %v1418_v47 = vadd.f32 %v1961_v39, %v2984_v9 }
 0x355   :  { %v1838_v33 = vpack.c.bf16 %v1418_v47, %v1415_v44  ;;  %v1962_v2 = vpop.f32.mrb[76].mxu0 }
 0x356   :  { %v1963_v16 = vpop.f32.mrb[77].mxu0 }
 0x357   :  { %1874 = vst [vmem:[#allocation10 + $0x50] sm:$0xff] %v1838_v33   ;;  %v1964_v57 = vadd.f32 %v1963_v16, %v1962_v2  ;;  %v1965_v38 = vpop.f32.mrb[78].mxu0 }
 0x358   :  { %v1966_v15 = vpop.f32.mrb[79].mxu0 }
 0x359   :  { %v1967_v56 = vadd.f32 %v1966_v15, %v1965_v38  ;;  %v1423_v22 = vadd.f32 %v1964_v57, %v2984_v9 }
 0x35b   :  { %v1426_v49 = vadd.f32 %v1967_v56, %v2984_v9 }
 0x35d   :  { %v1843_v36 = vpack.c.bf16 %v1426_v49, %v1423_v22  ;;  %v1968_v53 = vpop.f32.mrb[80].mxu0 }
 0x35e   :  { %v1969_v46 = vpop.f32.mrb[81].mxu0 }
 0x35f   :  { %1875 = vst [vmem:[#allocation10 + $0x58] sm:$0xff] %v1843_v36   ;;  %v1970_v17 = vadd.f32 %v1969_v46, %v1968_v53  ;;  %v1971_v40 = vpop.f32.mrb[82].mxu0 }
 0x360   :  { %v1972_v20 = vpop.f32.mrb[83].mxu0 }
 0x361   :  { %v1973_v50 = vadd.f32 %v1972_v20, %v1971_v40  ;;  %v1431_v13 = vadd.f32 %v1970_v17, %v2984_v9 }
 0x363   :  { %v1434_v59 = vadd.f32 %v1973_v50, %v2984_v9 }
 0x365   :  { %v1848_v0 = vpack.c.bf16 %v1434_v59, %v1431_v13  ;;  %v1974_v23 = vpop.f32.mrb[84].mxu0 }
 0x366   :  { %v1975_v60 = vpop.f32.mrb[85].mxu0 }
 0x367   :  { %1876 = vst [vmem:[#allocation10 + $0x60] sm:$0xff] %v1848_v0   ;;  %v1976_v48 = vadd.f32 %v1975_v60, %v1974_v23  ;;  %v1977_v32 = vpop.f32.mrb[86].mxu0 }
 0x368   :  { %v1978_v41 = vpop.f32.mrb[87].mxu0 }
 0x369   :  { %v1979_v61 = vadd.f32 %v1978_v41, %v1977_v32  ;;  %v1439_v27 = vadd.f32 %v1976_v48, %v2984_v9 }
 0x36b   :  { %v1442_v63 = vadd.f32 %v1979_v61, %v2984_v9 }
 0x36d   :  { %v1853_v26 = vpack.c.bf16 %v1442_v63, %v1439_v27  ;;  %v1980_v55 = vpop.f32.mrb[88].mxu0 }
 0x36e   :  { %v1981_v35 = vpop.f32.mrb[89].mxu0 }
 0x36f   :  { %1877 = vst [vmem:[#allocation10 + $0x68] sm:$0xff] %v1853_v26   ;;  %v1982_v54 = vadd.f32 %v1981_v35, %v1980_v55  ;;  %v1983_v3 = vpop.f32.mrb[90].mxu0 }
 0x370   :  { %v1984_v25 = vpop.f32.mrb[91].mxu0 }
 0x371   :  { %v1985_v37 = vadd.f32 %v1984_v25, %v1983_v3  ;;  %v1447_v21 = vadd.f32 %v1982_v54, %v2984_v9 }
 0x373   :  { %v1450_v5 = vadd.f32 %v1985_v37, %v2984_v9 }
 0x375   :  { %v1858_v62 = vpack.c.bf16 %v1450_v5, %v1447_v21  ;;  %v1986_v45 = vpop.f32.mrb[92].mxu0 }
 0x376   :  { %v1987_v18 = vpop.f32.mrb[93].mxu0 }
 0x377   :  { %1878 = vst [vmem:[#allocation10 + $0x70] sm:$0xff] %v1858_v62   ;;  %v1988_v58 = vadd.f32 %v1987_v18, %v1986_v45  ;;  %v1989_v4 = vpop.f32.mrb[94].mxu0 }
 0x378   :  { %v1990_v11 = vpop.f32.mrb[95].mxu0 }
 0x379   :  { %v1991_v28 = vadd.f32 %v1990_v11, %v1989_v4  ;;  %v1455_v10 = vadd.f32 %v1988_v58, %v2984_v9 }
 0x37b   :  { %v1458_v30 = vadd.f32 %v1991_v28, %v2984_v9 }
 0x37d   :  { %v1863_v19 = vpack.c.bf16 %v1458_v30, %v1455_v10 }
 0x37f   :  { %1879 = vst [vmem:[#allocation10 + $0x78] sm:$0xff] %v1863_v19  }
 0x380   :  { %2221 = shalt.err (!%p2218_p8)
}
 0x381   :  { %s2222_s14 = scalar_lea.hbm %s3040_s7, 2048 }
 0x382   :  { %p2223_p9 = scmp.ne.s32.totalorder %s3040_s7, %s2222_s14  ;;  %p2226_p10 = scmp.lt.u32.totalorder %s2222_s14, %s3040_s7 }
 0x384   :  { %p2228_p11 = pnand %p2226_p10, %p2223_p9 }
 0x386   :  { %2231 = shalt.err (!%p2228_p11)
}
 0x387   :  { %1632 = dma.vmem_to_hbm [thread:$0]  %s1627_s8, 2048, %s3040_s7, [#allocation4], %s2244_s1, %s2244_s1, %s2245_s25  }
 0x388   :  { %2238 = dma.done.wait [#allocation4], 2048  }
 0x389   :  { %2239 = vsyncadd [#allocation4], 4294965248 }
 0x38a   :  { %1636 = vsyncpa [#allocation3], 1 }
 0x38b   :  { %1637 = vsyncpa [#allocation6], 1 }
 0x38c   :  { %1638 = vsyncpa [#allocation9], 1 }
 0x38d   :  { %1639 = vsyncpa [#allocation4], 1 }

</bundles_post_ra>
